<compile_context>
chip_gen: v7x
topology: tpu7x:2x2x1
jax: 0.10.0
libtpu: 0.0.40
codegen_flags: <defaults>
</compile_context>

<pallas_src>
import functools

import numpy as np

import jax
import jax.numpy as jnp
from jax.experimental import pallas as pl
from jax.experimental.pallas import tpu as pltpu


# ----------------------------------------------------------------------------
# Constant interpolation matrices (built with numpy at trace time)
# ----------------------------------------------------------------------------
def _interp_matrix_1d(out_size, in_size):
    """align_corners=True linear interpolation matrix (out_size, in_size)."""
    m = np.zeros((out_size, in_size), np.float32)
    if in_size == 1 or out_size == 1:
        m[:, 0] = 1.0
        return m
    src = np.arange(out_size, dtype=np.float64) * (in_size - 1) / (out_size - 1)
    lo = np.floor(src).astype(np.int64)
    hi = np.minimum(lo + 1, in_size - 1)
    w = (src - lo).astype(np.float32)
    rows = np.arange(out_size)
    np.add.at(m, (rows, lo), 1.0 - w)
    np.add.at(m, (rows, hi), w)
    return m


def _bilinear_matrix(hd, wd, h, w):
    """U (h*w, hd*wd): flat bilinear(align_corners) upsample as a matmul."""
    return np.kron(_interp_matrix_1d(h, hd), _interp_matrix_1d(w, wd))


# ----------------------------------------------------------------------------
# JAX glue (NCHW): DownSample (adaptive max pool /2) + nearest 2x upsample
# ----------------------------------------------------------------------------
def downsample2_nchw(x):
    # TODO(synk): matches F.adaptive_max_pool2d((H//2, W//2)) only for even H, W.
    B, C, H, W = x.shape
    return x.reshape(B, C, H // 2, 2, W // 2, 2).max(axis=(3, 5))


def nearest_up_nchw(x, out_h, out_w):
    """F.interpolate(mode='nearest'); broadcast (no gather) for integer ratios."""
    B, C, H, W = x.shape
    if out_h % H == 0 and out_w % W == 0:
        rh, rw = out_h // H, out_w // W
        y = jnp.broadcast_to(x[:, :, :, None, :, None], (B, C, H, rh, W, rw))
        return y.reshape(B, C, out_h, out_w)
    # TODO(synk): gather fallback for non-integer ratios (not hit by FPN shapes).
    iy = (jnp.arange(out_h) * H) // out_h
    ix = (jnp.arange(out_w) * W) // out_w
    return jnp.take(jnp.take(x, iy, axis=2), ix, axis=3)


# ----------------------------------------------------------------------------
# Pallas kernel: fully fused SAFPN branch (channel-major, one batch / step)
#   qkv proj -> softmax attention (gamma folded into Wv) -> bilinear upsample
#   (constant matmul) -> [Wssa | Wssa+Wlat] matmul -> +bias [+ skip]
# ----------------------------------------------------------------------------
def _sa_branch_kernel(*refs, dk, has_upsample, has_skip):
    idx = 0
    if has_upsample:
        x_small_ref = refs[idx]; idx += 1        # (Cin, Nd)  f32
        u_ref = refs[idx]; idx += 1              # (Nd, N)    bf16 (constant)
    x_full_ref = refs[idx]; idx += 1             # (Cin, N)   f32
    wqkv_ref = refs[idx]; idx += 1               # (2dk+Cin, Cin) bf16
    bqkv_ref = refs[idx]; idx += 1               # (2dk+Cin, 1)   f32
    wout_ref = refs[idx]; idx += 1               # (Cout, 2Cin)   bf16
    bout_ref = refs[idx]; idx += 1               # (Cout, 1)      f32
    skip_ref = refs[idx] if has_skip else None   # (Cout, N)      f32
    o_ref = refs[-1]                             # (Cout, N)

    xf = x_full_ref[...]
    xs = x_small_ref[...] if has_upsample else xf

    # Fused q/k/v projection (channel-major), gamma already folded into Wv/bv.
    qkv = jnp.dot(wqkv_ref[...], xs.astype(jnp.bfloat16),
                  preferred_element_type=jnp.float32) + bqkv_ref[...]
    q_t = qkv[:dk]                               # (dk, Nd)
    k_t = qkv[dk:2 * dk]                         # (dk, Nd)
    v_t = qkv[2 * dk:]                           # (Cin, Nd)

    # scores s[i, j] = q_i . k_j  (contract dk)
    s = jax.lax.dot_general(q_t.astype(jnp.bfloat16), k_t.astype(jnp.bfloat16),
                            (((0,), (0,)), ((), ())),
                            preferred_element_type=jnp.float32)  # (Nd, Nd)

    # Single-tile row softmax (no online-softmax machinery; f32 on VPU/EUP).
    s = s - jnp.max(s, axis=-1, keepdims=True)
    p = jnp.exp(s)
    p = p * pl.reciprocal(jnp.sum(p, axis=-1, keepdims=True), approx=True)

    # attn^T (Cin, Nd_q) = v^T @ p^T
    attn_t = jax.lax.dot_general(v_t.astype(jnp.bfloat16), p.astype(jnp.bfloat16),
                                 (((1,), (1,)), ((), ())),
                                 preferred_element_type=jnp.float32)

    if has_upsample:
        # bilinear align_corners upsample as a constant matmul: (Cin, N)
        attn_t = jnp.dot(attn_t.astype(jnp.bfloat16), u_ref[...],
                         preferred_element_type=jnp.float32)

    # SSA_conv(attn + x) + lateral(x) == [Wssa | Wssa+Wlat]^T @ [attn; x] + b
    a_x = jnp.concatenate([attn_t, xf], axis=0).astype(jnp.bfloat16)  # (2Cin, N)
    out = jnp.dot(wout_ref[...], a_x,
                  preferred_element_type=jnp.float32) + bout_ref[...]
    if has_skip:
        out = out + skip_ref[...]
    o_ref[...] = out.astype(o_ref.dtype)


def sa_branch(x_nchw, sa_p, ssa_p, lat_p, *, use_down, skip_nchw=None):
    """One fused pallas_call computing one SAFPN pyramid level (NCHW in/out)."""
    B, Cin, H, W = x_nchw.shape
    N = H * W
    dk = int(sa_p["wq"].shape[1])
    Cout = int(ssa_p["w"].shape[1])

    # Fold gamma into the value projection and pre-pack channel-major weights.
    gamma = sa_p["gamma"]
    wqkv_t = jnp.concatenate(
        [sa_p["wq"], sa_p["wk"], gamma * sa_p["wv"]], axis=1).T        # (2dk+Cin, Cin)
    bqkv = jnp.concatenate(
        [sa_p["bq"], sa_p["bk"], gamma * sa_p["bv"]]).reshape(-1, 1)   # (2dk+Cin, 1)
    wout_t = jnp.concatenate(
        [ssa_p["w"], ssa_p["w"] + lat_p["w"]], axis=0).T               # (Cout, 2Cin)
    bout = (ssa_p["b"] + lat_p["b"]).reshape(-1, 1)                    # (Cout, 1)

    x_full = x_nchw.reshape(B, Cin, N)

    operands = []
    in_specs = []
    if use_down:
        xd = downsample2_nchw(x_nchw)
        Hd, Wd = xd.shape[2], xd.shape[3]
        Nd = Hd * Wd
        x_small = xd.reshape(B, Cin, Nd)
        u_t = jnp.asarray(_bilinear_matrix(Hd, Wd, H, W).T, dtype=jnp.bfloat16)
        operands += [x_small, u_t]
        in_specs += [
            pl.BlockSpec((pl.Squeezed(), Cin, Nd), lambda b: (b, 0, 0)),
            pl.BlockSpec((Nd, N), lambda b: (0, 0)),
        ]

    operands += [x_full,
                 wqkv_t.astype(jnp.bfloat16), bqkv,
                 wout_t.astype(jnp.bfloat16), bout]
    in_specs += [
        pl.BlockSpec((pl.Squeezed(), Cin, N), lambda b: (b, 0, 0)),
        pl.BlockSpec((2 * dk + Cin, Cin), lambda b: (0, 0)),
        pl.BlockSpec((2 * dk + Cin, 1), lambda b: (0, 0)),
        pl.BlockSpec((Cout, 2 * Cin), lambda b: (0, 0)),
        pl.BlockSpec((Cout, 1), lambda b: (0, 0)),
    ]
    if skip_nchw is not None:
        operands.append(skip_nchw.reshape(B, Cout, N))
        in_specs.append(pl.BlockSpec((pl.Squeezed(), Cout, N), lambda b: (b, 0, 0)))

    kernel = functools.partial(_sa_branch_kernel, dk=dk,
                               has_upsample=use_down,
                               has_skip=skip_nchw is not None)
    out = pl.pallas_call(
        kernel,
        out_shape=jax.ShapeDtypeStruct((B, Cout, N), x_nchw.dtype),
        grid=(B,),
        in_specs=in_specs,
        out_specs=pl.BlockSpec((pl.Squeezed(), Cout, N), lambda b: (b, 0, 0)),
        compiler_params=pltpu.CompilerParams(dimension_semantics=("parallel",)),
    )(*operands)
    return out.reshape(B, Cout, H, W)


# ----------------------------------------------------------------------------
# Pallas kernel: c2 lateral 1x1 conv + top-down skip (channel-major, N-tiled)
# ----------------------------------------------------------------------------
def _lateral_kernel(x_ref, w_ref, b_ref, skip_ref, o_ref):
    out = jnp.dot(w_ref[...], x_ref[...].astype(jnp.bfloat16),
                  preferred_element_type=jnp.float32)
    out = out + b_ref[...] + skip_ref[...]
    o_ref[...] = out.astype(o_ref.dtype)


def _pick_tile(n):
    if n % 128 == 0:
        for tn in (512, 384, 256, 128):
            if tn <= n and n % tn == 0:
                return tn
    return n


def lateral_conv(x_nchw, conv_p, skip_nchw):
    B, Cin, H, W = x_nchw.shape
    N = H * W
    Cout = int(conv_p["w"].shape[1])
    tn = _pick_tile(N)

    x = x_nchw.reshape(B, Cin, N)
    skip = skip_nchw.reshape(B, Cout, N)
    w_t = conv_p["w"].T.astype(jnp.bfloat16)          # (Cout, Cin)
    b = conv_p["b"].reshape(-1, 1)                    # (Cout, 1)

    out = pl.pallas_call(
        _lateral_kernel,
        out_shape=jax.ShapeDtypeStruct((B, Cout, N), x_nchw.dtype),
        grid=(B, N // tn),
        in_specs=[
            pl.BlockSpec((pl.Squeezed(), Cin, tn), lambda b_, j: (b_, 0, j)),
            pl.BlockSpec((Cout, Cin), lambda b_, j: (0, 0)),
            pl.BlockSpec((Cout, 1), lambda b_, j: (0, 0)),
            pl.BlockSpec((pl.Squeezed(), Cout, tn), lambda b_, j: (b_, 0, j)),
        ],
        out_specs=pl.BlockSpec((pl.Squeezed(), Cout, tn), lambda b_, j: (b_, 0, j)),
        compiler_params=pltpu.CompilerParams(
            dimension_semantics=("parallel", "parallel")),
    )(x, w_t, b, skip)
    return out.reshape(B, Cout, H, W)


# ----------------------------------------------------------------------------
# Parameter init (deterministic, synthetic weights)
# ----------------------------------------------------------------------------
def _init_conv1x1(key, cin, cout, scale=0.05):
    kw, kb = jax.random.split(key)
    return {"w": scale * jax.random.normal(kw, (cin, cout), jnp.float32),
            "b": scale * jax.random.normal(kb, (cout,), jnp.float32)}


def _init_sablock(key, c):
    # TODO(synk): SABlock source not provided with the reference module; guessed
    # SAGAN-style spatial self-attention (q/k: c->c//8, v: c->c, softmax over
    # keys, learned gamma scale, no 1/sqrt(dk), no internal residual).
    dk = max(c // 8, 1)
    kq, kk, kv = jax.random.split(key, 3)
    q = _init_conv1x1(kq, c, dk)
    k = _init_conv1x1(kk, c, dk)
    v = _init_conv1x1(kv, c, c)
    return {"wq": q["w"], "bq": q["b"],
            "wk": k["w"], "bk": k["b"],
            "wv": v["w"], "bv": v["b"],
            "gamma": jnp.float32(0.5)}


def init_safpn(key, in_channels_list, out_channels):
    keys = jax.random.split(key, 10)
    return {
        "ssa_c3": _init_sablock(keys[0], in_channels_list[1]),
        "ssa_c4": _init_sablock(keys[1], in_channels_list[2]),
        "ssa_c5": _init_sablock(keys[2], in_channels_list[3]),
        "ssa_c3_conv": _init_conv1x1(keys[3], in_channels_list[1], out_channels),
        "ssa_c4_conv": _init_conv1x1(keys[4], in_channels_list[2], out_channels),
        "ssa_c5_conv": _init_conv1x1(keys[5], in_channels_list[3], out_channels),
        "lat_c2": _init_conv1x1(keys[6], in_channels_list[0], out_channels),
        "lat_c3": _init_conv1x1(keys[7], in_channels_list[1], out_channels),
        "lat_c4": _init_conv1x1(keys[8], in_channels_list[2], out_channels),
        "lat_c5": _init_conv1x1(keys[9], in_channels_list[3], out_channels),
    }


# ----------------------------------------------------------------------------
# SAFPN forward (CARF=False, s=32) — NCHW in/out like PyTorch (no transposes)
# ----------------------------------------------------------------------------
def safpn_forward(params, c2, c3, c4, c5):
    p5 = sa_branch(c5, params["ssa_c5"], params["ssa_c5_conv"],
                   params["lat_c5"], use_down=False)
    p4 = sa_branch(c4, params["ssa_c4"], params["ssa_c4_conv"],
                   params["lat_c4"], use_down=True,
                   skip_nchw=nearest_up_nchw(p5, c4.shape[2], c4.shape[3]))
    p3 = sa_branch(c3, params["ssa_c3"], params["ssa_c3_conv"],
                   params["lat_c3"], use_down=True,
                   skip_nchw=nearest_up_nchw(p4, c3.shape[2], c3.shape[3]))
    p2 = lateral_conv(c2, params["lat_c2"],
                      skip_nchw=nearest_up_nchw(p3, c2.shape[2], c2.shape[3]))
    return p2, p3, p4, p5


# ----------------------------------------------------------------------------
# Pure-JAX reference (unfused, f32) for a numerical sanity check
# ----------------------------------------------------------------------------
def _interp_axis(x, out_size, axis):
    in_size = x.shape[axis]
    if out_size == in_size:
        return x
    if out_size == 1:
        src = jnp.zeros((1,), jnp.float32)
    else:
        src = jnp.arange(out_size, dtype=jnp.float32) * (in_size - 1) / (out_size - 1)
    lo = jnp.floor(src).astype(jnp.int32)
    hi = jnp.minimum(lo + 1, in_size - 1)
    w = (src - lo.astype(jnp.float32)).astype(x.dtype)
    shape = [1] * x.ndim
    shape[axis] = out_size
    w = w.reshape(shape)
    return jnp.take(x, lo, axis=axis) * (1 - w) + jnp.take(x, hi, axis=axis) * w


def _nearest_ref(x, out_h, out_w):
    B, C, H, W = x.shape
    iy = (jnp.arange(out_h) * H) // out_h
    ix = (jnp.arange(out_w) * W) // out_w
    return jnp.take(jnp.take(x, iy, axis=2), ix, axis=3)


def _ref_forward(params, c2, c3, c4, c5):
    def conv(x, w, b):
        return jnp.einsum("bchw,cd->bdhw", x, w) + b[None, :, None, None]

    def sab(x, p):
        B, C, H, W = x.shape
        N = H * W
        q = conv(x, p["wq"], p["bq"]).reshape(B, -1, N)
        k = conv(x, p["wk"], p["bk"]).reshape(B, -1, N)
        v = conv(x, p["wv"], p["bv"]).reshape(B, -1, N)
        a = jax.nn.softmax(jnp.einsum("bdn,bdm->bnm", q, k), axis=-1)
        o = jnp.einsum("bnm,bcm->bcn", a, v).reshape(B, C, H, W)
        return p["gamma"] * o

    def bilinear(x, out_h, out_w):
        return _interp_axis(_interp_axis(x, out_h, axis=2), out_w, axis=3)

    def branch(cx, sa_p, ssa_p, lat_p, use_down):
        H, W = cx.shape[2], cx.shape[3]
        if use_down:
            attn = bilinear(sab(downsample2_nchw(cx), sa_p), H, W)
        else:
            attn = sab(cx, sa_p)
        return (conv(attn + cx, ssa_p["w"], ssa_p["b"])
                + conv(cx, lat_p["w"], lat_p["b"]))

    f5 = branch(c5, params["ssa_c5"], params["ssa_c5_conv"], params["lat_c5"], False)
    f4 = branch(c4, params["ssa_c4"], params["ssa_c4_conv"], params["lat_c4"], True)
    f3 = branch(c3, params["ssa_c3"], params["ssa_c3_conv"], params["lat_c3"], True)
    f2 = conv(c2, params["lat_c2"]["w"], params["lat_c2"]["b"])
    p5 = f5
    p4 = f4 + _nearest_ref(p5, f4.shape[2], f4.shape[3])
    p3 = f3 + _nearest_ref(p4, f3.shape[2], f3.shape[3])
    p2 = f2 + _nearest_ref(p3, f2.shape[2], f2.shape[3])
    return p2, p3, p4, p5


# ----------------------------------------------------------------------------
if __name__ == "__main__":
    key = jax.random.PRNGKey(0)
    k_c2, k_c3, k_c4, k_c5, k_params = jax.random.split(key, 5)

    B = 2
    in_channels_list = [8, 16, 24, 32]
    out_channels = 16

    # FPN-style pyramid: c2 highest resolution, c5 lowest (NCHW).
    c2 = jax.random.normal(k_c2, (B, in_channels_list[0], 32, 32), jnp.float32)
    c3 = jax.random.normal(k_c3, (B, in_channels_list[1], 16, 16), jnp.float32)
    c4 = jax.random.normal(k_c4, (B, in_channels_list[2], 8, 8), jnp.float32)
    c5 = jax.random.normal(k_c5, (B, in_channels_list[3], 4, 4), jnp.float32)

    params = init_safpn(k_params, in_channels_list, out_channels)

    outs = jax.jit(safpn_forward)(params, c2, c3, c4, c5)
    jax.block_until_ready(outs)
    p2, p3, p4, p5 = outs

    assert p2.shape == (B, out_channels, 32, 32)
    assert p3.shape == (B, out_channels, 16, 16)
    assert p4.shape == (B, out_channels, 8, 8)
    assert p5.shape == (B, out_channels, 4, 4)

    refs = _ref_forward(params, c2, c3, c4, c5)
    for o, r in zip(outs, refs):
        err = float(jnp.max(jnp.abs(o - r)))
        assert jnp.allclose(o, r, rtol=2e-2, atol=2e-2), err

    print("KERNEL_OK")
</pallas_src>

<mosaic_0001>
module attributes {stable_mosaic.version = 11 : i64} {
  func.func @_sa_branch_kernel(%arg0: i32, %arg1: memref<1x32x16xf32, #tpu.memory_space<vmem>>, %arg2: memref<40x32xbf16, #tpu.memory_space<vmem>>, %arg3: memref<40x1xf32, #tpu.memory_space<vmem>>, %arg4: memref<16x64xbf16, #tpu.memory_space<vmem>>, %arg5: memref<16x1xf32, #tpu.memory_space<vmem>>, %arg6: memref<1x16x16xf32, #tpu.memory_space<vmem>>) attributes {dimension_semantics = [#tpu.dimension_semantics<parallel>], iteration_bounds = array<i64: 2>, scalar_prefetch = 0 : i64, scratch_operands = 0 : i64, tpu.core_type = #tpu.core_type<tc>, window_params = [{transform_indices = @transform_0, window_bounds = array<i64: 1, 32, 16>}, {pipeline_mode = #tpu.pipeline_mode<synchronous>, transform_indices = @transform_1, window_bounds = array<i64: 40, 32>}, {pipeline_mode = #tpu.pipeline_mode<synchronous>, transform_indices = @transform_2, window_bounds = array<i64: 40, 1>}, {pipeline_mode = #tpu.pipeline_mode<synchronous>, transform_indices = @transform_3, window_bounds = array<i64: 16, 64>}, {pipeline_mode = #tpu.pipeline_mode<synchronous>, transform_indices = @transform_4, window_bounds = array<i64: 16, 1>}, {transform_indices = @transform_5, window_bounds = array<i64: 1, 16, 16>}]} {
    %c0 = arith.constant 0 : index
    %c0_0 = arith.constant 0 : index
    %c0_1 = arith.constant 0 : index
    %0 = vector.load %arg1[%c0, %c0_0, %c0_1] : memref<1x32x16xf32, #tpu.memory_space<vmem>>, vector<1x32x16xf32>
    %1 = vector.shape_cast %0 : vector<1x32x16xf32> to vector<32x16xf32>
    %c0_2 = arith.constant 0 : index
    %c0_3 = arith.constant 0 : index
    %2 = vector.load %arg2[%c0_2, %c0_3] : memref<40x32xbf16, #tpu.memory_space<vmem>>, vector<40x32xbf16>
    %3 = arith.truncf %1 : vector<32x16xf32> to vector<32x16xbf16>
    %cst = arith.constant dense<0.000000e+00> : vector<40x16xf32>
    %4 = tpu.matmul %2, %3, %cst {dimension_numbers = #tpu.dot_dimension_numbers<[1], [0], [0], [1], [0, 0, 1, 1], [], []>} : vector<40x32xbf16>, vector<32x16xbf16>, vector<40x16xf32> -> vector<40x16xf32>
    %c0_4 = arith.constant 0 : index
    %c0_5 = arith.constant 0 : index
    %5 = vector.load %arg3[%c0_4, %c0_5] : memref<40x1xf32, #tpu.memory_space<vmem>>, vector<40x1xf32>
    %6 = vector.broadcast %5 : vector<40x1xf32> to vector<40x16xf32>
    %7 = arith.addf %4, %6 : vector<40x16xf32>
    %8 = vector.extract_strided_slice %7 {offsets = [0, 0], sizes = [4, 16], strides = [1, 1]} : vector<40x16xf32> to vector<4x16xf32>
    %9 = vector.extract_strided_slice %7 {offsets = [4, 0], sizes = [4, 16], strides = [1, 1]} : vector<40x16xf32> to vector<4x16xf32>
    %10 = vector.extract_strided_slice %7 {offsets = [8, 0], sizes = [32, 16], strides = [1, 1]} : vector<40x16xf32> to vector<32x16xf32>
    %11 = arith.truncf %8 : vector<4x16xf32> to vector<4x16xbf16>
    %12 = arith.truncf %9 : vector<4x16xf32> to vector<4x16xbf16>
    %cst_6 = arith.constant dense<0.000000e+00> : vector<16x16xf32>
    %13 = tpu.matmul %11, %12, %cst_6 {dimension_numbers = #tpu.dot_dimension_numbers<[0], [0], [1], [1], [0, 1, 1, 1], [], []>} : vector<4x16xbf16>, vector<4x16xbf16>, vector<16x16xf32> -> vector<16x16xf32>
    %cst_7 = arith.constant dense<0xFF800000> : vector<16xf32>
    %14 = vector.multi_reduction <maximumf>, %13, %cst_7 [1] : vector<16x16xf32> to vector<16xf32>
    %15 = vector.shape_cast %14 : vector<16xf32> to vector<16x1xf32>
    %16 = vector.broadcast %15 : vector<16x1xf32> to vector<16x16xf32>
    %17 = arith.subf %13, %16 : vector<16x16xf32>
    %18 = math.exp %17 : vector<16x16xf32>
    %cst_8 = arith.constant dense<0.000000e+00> : vector<16xf32>
    %19 = vector.multi_reduction <add>, %18, %cst_8 [1] : vector<16x16xf32> to vector<16xf32>
    %20 = vector.shape_cast %19 : vector<16xf32> to vector<16x1xf32>
    %21 = tpu.reciprocal %20 {approx = true} : vector<16x1xf32> -> vector<16x1xf32>
    %22 = vector.broadcast %21 : vector<16x1xf32> to vector<16x16xf32>
    %23 = arith.mulf %18, %22 : vector<16x16xf32>
    %24 = arith.truncf %10 : vector<32x16xf32> to vector<32x16xbf16>
    %25 = arith.truncf %23 : vector<16x16xf32> to vector<16x16xbf16>
    %cst_9 = arith.constant dense<0.000000e+00> : vector<32x16xf32>
    %26 = tpu.matmul %24, %25, %cst_9 {dimension_numbers = #tpu.dot_dimension_numbers<[1], [1], [0], [0], [0, 0, 1, 0], [], []>} : vector<32x16xbf16>, vector<16x16xbf16>, vector<32x16xf32> -> vector<32x16xf32>
    %27 = tpu.concatenate %26, %1 in 0 : vector<32x16xf32>, vector<32x16xf32> -> vector<64x16xf32>
    %28 = arith.truncf %27 : vector<64x16xf32> to vector<64x16xbf16>
    %c0_10 = arith.constant 0 : index
    %c0_11 = arith.constant 0 : index
    %29 = vector.load %arg4[%c0_10, %c0_11] : memref<16x64xbf16, #tpu.memory_space<vmem>>, vector<16x64xbf16>
    %cst_12 = arith.constant dense<0.000000e+00> : vector<16x16xf32>
    %30 = tpu.matmul %29, %28, %cst_12 {dimension_numbers = #tpu.dot_dimension_numbers<[1], [0], [0], [1], [0, 0, 1, 1], [], []>} : vector<16x64xbf16>, vector<64x16xbf16>, vector<16x16xf32> -> vector<16x16xf32>
    %c0_13 = arith.constant 0 : index
    %c0_14 = arith.constant 0 : index
    %31 = vector.load %arg5[%c0_13, %c0_14] : memref<16x1xf32, #tpu.memory_space<vmem>>, vector<16x1xf32>
    %32 = vector.broadcast %31 : vector<16x1xf32> to vector<16x16xf32>
    %33 = arith.addf %30, %32 : vector<16x16xf32>
    %c0_15 = arith.constant 0 : index
    %c0_16 = arith.constant 0 : index
    %c0_17 = arith.constant 0 : index
    %34 = vector.load %arg6[%c0_15, %c0_16, %c0_17] : memref<1x16x16xf32, #tpu.memory_space<vmem>>, vector<1x16x16xf32>
    %35 = vector.shape_cast %34 : vector<1x16x16xf32> to vector<16x16xf32>
    %36 = vector.shape_cast %33 : vector<16x16xf32> to vector<1x16x16xf32>
    tpu.vector_store %arg6[%c0_15, %c0_16, %c0_17], %36 {strides = array<i32>} : memref<1x16x16xf32, #tpu.memory_space<vmem>>, vector<1x16x16xf32>,
    return
  }
  func.func @transform_0(%arg0: i32) -> (i32, i32, i32) {
    %c0_i32 = arith.constant 0 : i32
    %c0_i32_0 = arith.constant 0 : i32
    %c0_i32_1 = arith.constant 0 : i32
    return %arg0, %c0_i32, %c0_i32_0 : i32, i32, i32
  }
  func.func @transform_1(%arg0: i32) -> (i32, i32) {
    %c0_i32 = arith.constant 0 : i32
    %c0_i32_0 = arith.constant 0 : i32
    %c0_i32_1 = arith.constant 0 : i32
    return %c0_i32, %c0_i32_0 : i32, i32
  }
  func.func @transform_2(%arg0: i32) -> (i32, i32) {
    %c0_i32 = arith.constant 0 : i32
    %c0_i32_0 = arith.constant 0 : i32
    %c0_i32_1 = arith.constant 0 : i32
    return %c0_i32, %c0_i32_0 : i32, i32
  }
  func.func @transform_3(%arg0: i32) -> (i32, i32) {
    %c0_i32 = arith.constant 0 : i32
    %c0_i32_0 = arith.constant 0 : i32
    %c0_i32_1 = arith.constant 0 : i32
    return %c0_i32, %c0_i32_0 : i32, i32
  }
  func.func @transform_4(%arg0: i32) -> (i32, i32) {
    %c0_i32 = arith.constant 0 : i32
    %c0_i32_0 = arith.constant 0 : i32
    %c0_i32_1 = arith.constant 0 : i32
    return %c0_i32, %c0_i32_0 : i32, i32
  }
  func.func @transform_5(%arg0: i32) -> (i32, i32, i32) {
    %c0_i32 = arith.constant 0 : i32
    %c0_i32_0 = arith.constant 0 : i32
    %c0_i32_1 = arith.constant 0 : i32
    return %arg0, %c0_i32, %c0_i32_0 : i32, i32, i32
  }
}

module attributes {stable_mosaic.version = 11 : i64} {
  func.func @_sa_branch_kernel(%arg0: i32, %arg1: memref<1x24x16xf32, #tpu.memory_space<vmem>>, %arg2: memref<16x64xbf16, #tpu.memory_space<vmem>>, %arg3: memref<1x24x64xf32, #tpu.memory_space<vmem>>, %arg4: memref<30x24xbf16, #tpu.memory_space<vmem>>, %arg5: memref<30x1xf32, #tpu.memory_space<vmem>>, %arg6: memref<16x48xbf16, #tpu.memory_space<vmem>>, %arg7: memref<16x1xf32, #tpu.memory_space<vmem>>, %arg8: memref<1x16x64xf32, #tpu.memory_space<vmem>>, %arg9: memref<1x16x64xf32, #tpu.memory_space<vmem>>) attributes {dimension_semantics = [#tpu.dimension_semantics<parallel>], iteration_bounds = array<i64: 2>, scalar_prefetch = 0 : i64, scratch_operands = 0 : i64, tpu.core_type = #tpu.core_type<tc>, window_params = [{transform_indices = @transform_0, window_bounds = array<i64: 1, 24, 16>}, {pipeline_mode = #tpu.pipeline_mode<synchronous>, transform_indices = @transform_1, window_bounds = array<i64: 16, 64>}, {transform_indices = @transform_2, window_bounds = array<i64: 1, 24, 64>}, {pipeline_mode = #tpu.pipeline_mode<synchronous>, transform_indices = @transform_3, window_bounds = array<i64: 30, 24>}, {pipeline_mode = #tpu.pipeline_mode<synchronous>, transform_indices = @transform_4, window_bounds = array<i64: 30, 1>}, {pipeline_mode = #tpu.pipeline_mode<synchronous>, transform_indices = @transform_5, window_bounds = array<i64: 16, 48>}, {pipeline_mode = #tpu.pipeline_mode<synchronous>, transform_indices = @transform_6, window_bounds = array<i64: 16, 1>}, {transform_indices = @transform_7, window_bounds = array<i64: 1, 16, 64>}, {transform_indices = @transform_8, window_bounds = array<i64: 1, 16, 64>}]} {
    %c0 = arith.constant 0 : index
    %c0_0 = arith.constant 0 : index
    %c0_1 = arith.constant 0 : index
    %0 = vector.load %arg3[%c0, %c0_0, %c0_1] : memref<1x24x64xf32, #tpu.memory_space<vmem>>, vector<1x24x64xf32>
    %1 = vector.shape_cast %0 : vector<1x24x64xf32> to vector<24x64xf32>
    %c0_2 = arith.constant 0 : index
    %c0_3 = arith.constant 0 : index
    %c0_4 = arith.constant 0 : index
    %2 = vector.load %arg1[%c0_2, %c0_3, %c0_4] : memref<1x24x16xf32, #tpu.memory_space<vmem>>, vector<1x24x16xf32>
    %3 = vector.shape_cast %2 : vector<1x24x16xf32> to vector<24x16xf32>
    %c0_5 = arith.constant 0 : index
    %c0_6 = arith.constant 0 : index
    %4 = vector.load %arg4[%c0_5, %c0_6] : memref<30x24xbf16, #tpu.memory_space<vmem>>, vector<30x24xbf16>
    %5 = arith.truncf %3 : vector<24x16xf32> to vector<24x16xbf16>
    %cst = arith.constant dense<0.000000e+00> : vector<30x16xf32>
    %6 = tpu.matmul %4, %5, %cst {dimension_numbers = #tpu.dot_dimension_numbers<[1], [0], [0], [1], [0, 0, 1, 1], [], []>} : vector<30x24xbf16>, vector<24x16xbf16>, vector<30x16xf32> -> vector<30x16xf32>
    %c0_7 = arith.constant 0 : index
    %c0_8 = arith.constant 0 : index
    %7 = vector.load %arg5[%c0_7, %c0_8] : memref<30x1xf32, #tpu.memory_space<vmem>>, vector<30x1xf32>
    %8 = vector.broadcast %7 : vector<30x1xf32> to vector<30x16xf32>
    %9 = arith.addf %6, %8 : vector<30x16xf32>
    %10 = vector.extract_strided_slice %9 {offsets = [0, 0], sizes = [3, 16], strides = [1, 1]} : vector<30x16xf32> to vector<3x16xf32>
    %11 = vector.extract_strided_slice %9 {offsets = [3, 0], sizes = [3, 16], strides = [1, 1]} : vector<30x16xf32> to vector<3x16xf32>
    %12 = vector.extract_strided_slice %9 {offsets = [6, 0], sizes = [24, 16], strides = [1, 1]} : vector<30x16xf32> to vector<24x16xf32>
    %13 = arith.truncf %10 : vector<3x16xf32> to vector<3x16xbf16>
    %14 = arith.truncf %11 : vector<3x16xf32> to vector<3x16xbf16>
    %cst_9 = arith.constant dense<0.000000e+00> : vector<16x16xf32>
    %15 = tpu.matmul %13, %14, %cst_9 {dimension_numbers = #tpu.dot_dimension_numbers<[0], [0], [1], [1], [0, 1, 1, 1], [], []>} : vector<3x16xbf16>, vector<3x16xbf16>, vector<16x16xf32> -> vector<16x16xf32>
    %cst_10 = arith.constant dense<0xFF800000> : vector<16xf32>
    %16 = vector.multi_reduction <maximumf>, %15, %cst_10 [1] : vector<16x16xf32> to vector<16xf32>
    %17 = vector.shape_cast %16 : vector<16xf32> to vector<16x1xf32>
    %18 = vector.broadcast %17 : vector<16x1xf32> to vector<16x16xf32>
    %19 = arith.subf %15, %18 : vector<16x16xf32>
    %20 = math.exp %19 : vector<16x16xf32>
    %cst_11 = arith.constant dense<0.000000e+00> : vector<16xf32>
    %21 = vector.multi_reduction <add>, %20, %cst_11 [1] : vector<16x16xf32> to vector<16xf32>
    %22 = vector.shape_cast %21 : vector<16xf32> to vector<16x1xf32>
    %23 = tpu.reciprocal %22 {approx = true} : vector<16x1xf32> -> vector<16x1xf32>
    %24 = vector.broadcast %23 : vector<16x1xf32> to vector<16x16xf32>
    %25 = arith.mulf %20, %24 : vector<16x16xf32>
    %26 = arith.truncf %12 : vector<24x16xf32> to vector<24x16xbf16>
    %27 = arith.truncf %25 : vector<16x16xf32> to vector<16x16xbf16>
    %cst_12 = arith.constant dense<0.000000e+00> : vector<24x16xf32>
    %28 = tpu.matmul %26, %27, %cst_12 {dimension_numbers = #tpu.dot_dimension_numbers<[1], [1], [0], [0], [0, 0, 1, 0], [], []>} : vector<24x16xbf16>, vector<16x16xbf16>, vector<24x16xf32> -> vector<24x16xf32>
    %29 = arith.truncf %28 : vector<24x16xf32> to vector<24x16xbf16>
    %c0_13 = arith.constant 0 : index
    %c0_14 = arith.constant 0 : index
    %30 = vector.load %arg2[%c0_13, %c0_14] : memref<16x64xbf16, #tpu.memory_space<vmem>>, vector<16x64xbf16>
    %cst_15 = arith.constant dense<0.000000e+00> : vector<24x64xf32>
    %31 = tpu.matmul %29, %30, %cst_15 {dimension_numbers = #tpu.dot_dimension_numbers<[1], [0], [0], [1], [0, 0, 1, 1], [], []>} : vector<24x16xbf16>, vector<16x64xbf16>, vector<24x64xf32> -> vector<24x64xf32>
    %32 = tpu.concatenate %31, %1 in 0 : vector<24x64xf32>, vector<24x64xf32> -> vector<48x64xf32>
    %33 = arith.truncf %32 : vector<48x64xf32> to vector<48x64xbf16>
    %c0_16 = arith.constant 0 : index
    %c0_17 = arith.constant 0 : index
    %34 = vector.load %arg6[%c0_16, %c0_17] : memref<16x48xbf16, #tpu.memory_space<vmem>>, vector<16x48xbf16>
    %cst_18 = arith.constant dense<0.000000e+00> : vector<16x64xf32>
    %35 = tpu.matmul %34, %33, %cst_18 {dimension_numbers = #tpu.dot_dimension_numbers<[1], [0], [0], [1], [0, 0, 1, 1], [], []>} : vector<16x48xbf16>, vector<48x64xbf16>, vector<16x64xf32> -> vector<16x64xf32>
    %c0_19 = arith.constant 0 : index
    %c0_20 = arith.constant 0 : index
    %36 = vector.load %arg7[%c0_19, %c0_20] : memref<16x1xf32, #tpu.memory_space<vmem>>, vector<16x1xf32>
    %37 = vector.broadcast %36 : vector<16x1xf32> to vector<16x64xf32>
    %38 = arith.addf %35, %37 : vector<16x64xf32>
    %c0_21 = arith.constant 0 : index
    %c0_22 = arith.constant 0 : index
    %c0_23 = arith.constant 0 : index
    %39 = vector.load %arg8[%c0_21, %c0_22, %c0_23] : memref<1x16x64xf32, #tpu.memory_space<vmem>>, vector<1x16x64xf32>
    %40 = vector.shape_cast %39 : vector<1x16x64xf32> to vector<16x64xf32>
    %41 = arith.addf %38, %40 : vector<16x64xf32>
    %c0_24 = arith.constant 0 : index
    %c0_25 = arith.constant 0 : index
    %c0_26 = arith.constant 0 : index
    %42 = vector.load %arg9[%c0_24, %c0_25, %c0_26] : memref<1x16x64xf32, #tpu.memory_space<vmem>>, vector<1x16x64xf32>
    %43 = vector.shape_cast %42 : vector<1x16x64xf32> to vector<16x64xf32>
    %44 = vector.shape_cast %41 : vector<16x64xf32> to vector<1x16x64xf32>
    tpu.vector_store %arg9[%c0_24, %c0_25, %c0_26], %44 {strides = array<i32>} : memref<1x16x64xf32, #tpu.memory_space<vmem>>, vector<1x16x64xf32>,
    return
  }
  func.func @transform_0(%arg0: i32) -> (i32, i32, i32) {
    %c0_i32 = arith.constant 0 : i32
    %c0_i32_0 = arith.constant 0 : i32
    %c0_i32_1 = arith.constant 0 : i32
    return %arg0, %c0_i32, %c0_i32_0 : i32, i32, i32
  }
  func.func @transform_1(%arg0: i32) -> (i32, i32) {
    %c0_i32 = arith.constant 0 : i32
    %c0_i32_0 = arith.constant 0 : i32
    %c0_i32_1 = arith.constant 0 : i32
    return %c0_i32, %c0_i32_0 : i32, i32
  }
  func.func @transform_2(%arg0: i32) -> (i32, i32, i32) {
    %c0_i32 = arith.constant 0 : i32
    %c0_i32_0 = arith.constant 0 : i32
    %c0_i32_1 = arith.constant 0 : i32
    return %arg0, %c0_i32, %c0_i32_0 : i32, i32, i32
  }
  func.func @transform_3(%arg0: i32) -> (i32, i32) {
    %c0_i32 = arith.constant 0 : i32
    %c0_i32_0 = arith.constant 0 : i32
    %c0_i32_1 = arith.constant 0 : i32
    return %c0_i32, %c0_i32_0 : i32, i32
  }
  func.func @transform_4(%arg0: i32) -> (i32, i32) {
    %c0_i32 = arith.constant 0 : i32
    %c0_i32_0 = arith.constant 0 : i32
    %c0_i32_1 = arith.constant 0 : i32
    return %c0_i32, %c0_i32_0 : i32, i32
  }
  func.func @transform_5(%arg0: i32) -> (i32, i32) {
    %c0_i32 = arith.constant 0 : i32
    %c0_i32_0 = arith.constant 0 : i32
    %c0_i32_1 = arith.constant 0 : i32
    return %c0_i32, %c0_i32_0 : i32, i32
  }
  func.func @transform_6(%arg0: i32) -> (i32, i32) {
    %c0_i32 = arith.constant 0 : i32
    %c0_i32_0 = arith.constant 0 : i32
    %c0_i32_1 = arith.constant 0 : i32
    return %c0_i32, %c0_i32_0 : i32, i32
  }
  func.func @transform_7(%arg0: i32) -> (i32, i32, i32) {
    %c0_i32 = arith.constant 0 : i32
    %c0_i32_0 = arith.constant 0 : i32
    %c0_i32_1 = arith.constant 0 : i32
    return %arg0, %c0_i32, %c0_i32_0 : i32, i32, i32
  }
  func.func @transform_8(%arg0: i32) -> (i32, i32, i32) {
    %c0_i32 = arith.constant 0 : i32
    %c0_i32_0 = arith.constant 0 : i32
    %c0_i32_1 = arith.constant 0 : i32
    return %arg0, %c0_i32, %c0_i32_0 : i32, i32, i32
  }
}

module attributes {stable_mosaic.version = 11 : i64} {
  func.func @_sa_branch_kernel(%arg0: i32, %arg1: memref<1x16x64xf32, #tpu.memory_space<vmem>>, %arg2: memref<64x256xbf16, #tpu.memory_space<vmem>>, %arg3: memref<1x16x256xf32, #tpu.memory_space<vmem>>, %arg4: memref<20x16xbf16, #tpu.memory_space<vmem>>, %arg5: memref<20x1xf32, #tpu.memory_space<vmem>>, %arg6: memref<16x32xbf16, #tpu.memory_space<vmem>>, %arg7: memref<16x1xf32, #tpu.memory_space<vmem>>, %arg8: memref<1x16x256xf32, #tpu.memory_space<vmem>>, %arg9: memref<1x16x256xf32, #tpu.memory_space<vmem>>) attributes {dimension_semantics = [#tpu.dimension_semantics<parallel>], iteration_bounds = array<i64: 2>, scalar_prefetch = 0 : i64, scratch_operands = 0 : i64, tpu.core_type = #tpu.core_type<tc>, window_params = [{transform_indices = @transform_0, window_bounds = array<i64: 1, 16, 64>}, {pipeline_mode = #tpu.pipeline_mode<synchronous>, transform_indices = @transform_1, window_bounds = array<i64: 64, 256>}, {transform_indices = @transform_2, window_bounds = array<i64: 1, 16, 256>}, {pipeline_mode = #tpu.pipeline_mode<synchronous>, transform_indices = @transform_3, window_bounds = array<i64: 20, 16>}, {pipeline_mode = #tpu.pipeline_mode<synchronous>, transform_indices = @transform_4, window_bounds = array<i64: 20, 1>}, {pipeline_mode = #tpu.pipeline_mode<synchronous>, transform_indices = @transform_5, window_bounds = array<i64: 16, 32>}, {pipeline_mode = #tpu.pipeline_mode<synchronous>, transform_indices = @transform_6, window_bounds = array<i64: 16, 1>}, {transform_indices = @transform_7, window_bounds = array<i64: 1, 16, 256>}, {transform_indices = @transform_8, window_bounds = array<i64: 1, 16, 256>}]} {
    %c0 = arith.constant 0 : index
    %c0_0 = arith.constant 0 : index
    %c0_1 = arith.constant 0 : index
    %0 = vector.load %arg3[%c0, %c0_0, %c0_1] : memref<1x16x256xf32, #tpu.memory_space<vmem>>, vector<1x16x256xf32>
    %1 = vector.shape_cast %0 : vector<1x16x256xf32> to vector<16x256xf32>
    %c0_2 = arith.constant 0 : index
    %c0_3 = arith.constant 0 : index
    %c0_4 = arith.constant 0 : index
    %2 = vector.load %arg1[%c0_2, %c0_3, %c0_4] : memref<1x16x64xf32, #tpu.memory_space<vmem>>, vector<1x16x64xf32>
    %3 = vector.shape_cast %2 : vector<1x16x64xf32> to vector<16x64xf32>
    %c0_5 = arith.constant 0 : index
    %c0_6 = arith.constant 0 : index
    %4 = vector.load %arg4[%c0_5, %c0_6] : memref<20x16xbf16, #tpu.memory_space<vmem>>, vector<20x16xbf16>
    %5 = arith.truncf %3 : vector<16x64xf32> to vector<16x64xbf16>
    %cst = arith.constant dense<0.000000e+00> : vector<20x64xf32>
    %6 = tpu.matmul %4, %5, %cst {dimension_numbers = #tpu.dot_dimension_numbers<[1], [0], [0], [1], [0, 0, 1, 1], [], []>} : vector<20x16xbf16>, vector<16x64xbf16>, vector<20x64xf32> -> vector<20x64xf32>
    %c0_7 = arith.constant 0 : index
    %c0_8 = arith.constant 0 : index
    %7 = vector.load %arg5[%c0_7, %c0_8] : memref<20x1xf32, #tpu.memory_space<vmem>>, vector<20x1xf32>
    %8 = vector.broadcast %7 : vector<20x1xf32> to vector<20x64xf32>
    %9 = arith.addf %6, %8 : vector<20x64xf32>
    %10 = vector.extract_strided_slice %9 {offsets = [0, 0], sizes = [2, 64], strides = [1, 1]} : vector<20x64xf32> to vector<2x64xf32>
    %11 = vector.extract_strided_slice %9 {offsets = [2, 0], sizes = [2, 64], strides = [1, 1]} : vector<20x64xf32> to vector<2x64xf32>
    %12 = vector.extract_strided_slice %9 {offsets = [4, 0], sizes = [16, 64], strides = [1, 1]} : vector<20x64xf32> to vector<16x64xf32>
    %13 = arith.truncf %10 : vector<2x64xf32> to vector<2x64xbf16>
    %14 = arith.truncf %11 : vector<2x64xf32> to vector<2x64xbf16>
    %cst_9 = arith.constant dense<0.000000e+00> : vector<64x64xf32>
    %15 = tpu.matmul %13, %14, %cst_9 {dimension_numbers = #tpu.dot_dimension_numbers<[0], [0], [1], [1], [0, 1, 1, 1], [], []>} : vector<2x64xbf16>, vector<2x64xbf16>, vector<64x64xf32> -> vector<64x64xf32>
    %cst_10 = arith.constant dense<0xFF800000> : vector<64xf32>
    %16 = vector.multi_reduction <maximumf>, %15, %cst_10 [1] : vector<64x64xf32> to vector<64xf32>
    %17 = vector.shape_cast %16 : vector<64xf32> to vector<64x1xf32>
    %18 = vector.broadcast %17 : vector<64x1xf32> to vector<64x64xf32>
    %19 = arith.subf %15, %18 : vector<64x64xf32>
    %20 = math.exp %19 : vector<64x64xf32>
    %cst_11 = arith.constant dense<0.000000e+00> : vector<64xf32>
    %21 = vector.multi_reduction <add>, %20, %cst_11 [1] : vector<64x64xf32> to vector<64xf32>
    %22 = vector.shape_cast %21 : vector<64xf32> to vector<64x1xf32>
    %23 = tpu.reciprocal %22 {approx = true} : vector<64x1xf32> -> vector<64x1xf32>
    %24 = vector.broadcast %23 : vector<64x1xf32> to vector<64x64xf32>
    %25 = arith.mulf %20, %24 : vector<64x64xf32>
    %26 = arith.truncf %12 : vector<16x64xf32> to vector<16x64xbf16>
    %27 = arith.truncf %25 : vector<64x64xf32> to vector<64x64xbf16>
    %cst_12 = arith.constant dense<0.000000e+00> : vector<16x64xf32>
    %28 = tpu.matmul %26, %27, %cst_12 {dimension_numbers = #tpu.dot_dimension_numbers<[1], [1], [0], [0], [0, 0, 1, 0], [], []>} : vector<16x64xbf16>, vector<64x64xbf16>, vector<16x64xf32> -> vector<16x64xf32>
    %29 = arith.truncf %28 : vector<16x64xf32> to vector<16x64xbf16>
    %c0_13 = arith.constant 0 : index
    %c0_14 = arith.constant 0 : index
    %30 = vector.load %arg2[%c0_13, %c0_14] : memref<64x256xbf16, #tpu.memory_space<vmem>>, vector<64x256xbf16>
    %cst_15 = arith.constant dense<0.000000e+00> : vector<16x256xf32>
    %31 = tpu.matmul %29, %30, %cst_15 {dimension_numbers = #tpu.dot_dimension_numbers<[1], [0], [0], [1], [0, 0, 1, 1], [], []>} : vector<16x64xbf16>, vector<64x256xbf16>, vector<16x256xf32> -> vector<16x256xf32>
    %32 = tpu.concatenate %31, %1 in 0 : vector<16x256xf32>, vector<16x256xf32> -> vector<32x256xf32>
    %33 = arith.truncf %32 : vector<32x256xf32> to vector<32x256xbf16>
    %c0_16 = arith.constant 0 : index
    %c0_17 = arith.constant 0 : index
    %34 = vector.load %arg6[%c0_16, %c0_17] : memref<16x32xbf16, #tpu.memory_space<vmem>>, vector<16x32xbf16>
    %cst_18 = arith.constant dense<0.000000e+00> : vector<16x256xf32>
    %35 = tpu.matmul %34, %33, %cst_18 {dimension_numbers = #tpu.dot_dimension_numbers<[1], [0], [0], [1], [0, 0, 1, 1], [], []>} : vector<16x32xbf16>, vector<32x256xbf16>, vector<16x256xf32> -> vector<16x256xf32>
    %c0_19 = arith.constant 0 : index
    %c0_20 = arith.constant 0 : index
    %36 = vector.load %arg7[%c0_19, %c0_20] : memref<16x1xf32, #tpu.memory_space<vmem>>, vector<16x1xf32>
    %37 = vector.broadcast %36 : vector<16x1xf32> to vector<16x256xf32>
    %38 = arith.addf %35, %37 : vector<16x256xf32>
    %c0_21 = arith.constant 0 : index
    %c0_22 = arith.constant 0 : index
    %c0_23 = arith.constant 0 : index
    %39 = vector.load %arg8[%c0_21, %c0_22, %c0_23] : memref<1x16x256xf32, #tpu.memory_space<vmem>>, vector<1x16x256xf32>
    %40 = vector.shape_cast %39 : vector<1x16x256xf32> to vector<16x256xf32>
    %41 = arith.addf %38, %40 : vector<16x256xf32>
    %c0_24 = arith.constant 0 : index
    %c0_25 = arith.constant 0 : index
    %c0_26 = arith.constant 0 : index
    %42 = vector.load %arg9[%c0_24, %c0_25, %c0_26] : memref<1x16x256xf32, #tpu.memory_space<vmem>>, vector<1x16x256xf32>
    %43 = vector.shape_cast %42 : vector<1x16x256xf32> to vector<16x256xf32>
    %44 = vector.shape_cast %41 : vector<16x256xf32> to vector<1x16x256xf32>
    tpu.vector_store %arg9[%c0_24, %c0_25, %c0_26], %44 {strides = array<i32>} : memref<1x16x256xf32, #tpu.memory_space<vmem>>, vector<1x16x256xf32>,
    return
  }
  func.func @transform_0(%arg0: i32) -> (i32, i32, i32) {
    %c0_i32 = arith.constant 0 : i32
    %c0_i32_0 = arith.constant 0 : i32
    %c0_i32_1 = arith.constant 0 : i32
    return %arg0, %c0_i32, %c0_i32_0 : i32, i32, i32
  }
  func.func @transform_1(%arg0: i32) -> (i32, i32) {
    %c0_i32 = arith.constant 0 : i32
    %c0_i32_0 = arith.constant 0 : i32
    %c0_i32_1 = arith.constant 0 : i32
    return %c0_i32, %c0_i32_0 : i32, i32
  }
  func.func @transform_2(%arg0: i32) -> (i32, i32, i32) {
    %c0_i32 = arith.constant 0 : i32
    %c0_i32_0 = arith.constant 0 : i32
    %c0_i32_1 = arith.constant 0 : i32
    return %arg0, %c0_i32, %c0_i32_0 : i32, i32, i32
  }
  func.func @transform_3(%arg0: i32) -> (i32, i32) {
    %c0_i32 = arith.constant 0 : i32
    %c0_i32_0 = arith.constant 0 : i32
    %c0_i32_1 = arith.constant 0 : i32
    return %c0_i32, %c0_i32_0 : i32, i32
  }
  func.func @transform_4(%arg0: i32) -> (i32, i32) {
    %c0_i32 = arith.constant 0 : i32
    %c0_i32_0 = arith.constant 0 : i32
    %c0_i32_1 = arith.constant 0 : i32
    return %c0_i32, %c0_i32_0 : i32, i32
  }
  func.func @transform_5(%arg0: i32) -> (i32, i32) {
    %c0_i32 = arith.constant 0 : i32
    %c0_i32_0 = arith.constant 0 : i32
    %c0_i32_1 = arith.constant 0 : i32
    return %c0_i32, %c0_i32_0 : i32, i32
  }
  func.func @transform_6(%arg0: i32) -> (i32, i32) {
    %c0_i32 = arith.constant 0 : i32
    %c0_i32_0 = arith.constant 0 : i32
    %c0_i32_1 = arith.constant 0 : i32
    return %c0_i32, %c0_i32_0 : i32, i32
  }
  func.func @transform_7(%arg0: i32) -> (i32, i32, i32) {
    %c0_i32 = arith.constant 0 : i32
    %c0_i32_0 = arith.constant 0 : i32
    %c0_i32_1 = arith.constant 0 : i32
    return %arg0, %c0_i32, %c0_i32_0 : i32, i32, i32
  }
  func.func @transform_8(%arg0: i32) -> (i32, i32, i32) {
    %c0_i32 = arith.constant 0 : i32
    %c0_i32_0 = arith.constant 0 : i32
    %c0_i32_1 = arith.constant 0 : i32
    return %arg0, %c0_i32, %c0_i32_0 : i32, i32, i32
  }
}

module attributes {stable_mosaic.version = 11 : i64} {
  func.func @_lateral_kernel(%arg0: i32, %arg1: i32, %arg2: memref<1x8x512xf32, #tpu.memory_space<vmem>>, %arg3: memref<16x8xbf16, #tpu.memory_space<vmem>>, %arg4: memref<16x1xf32, #tpu.memory_space<vmem>>, %arg5: memref<1x16x512xf32, #tpu.memory_space<vmem>>, %arg6: memref<1x16x512xf32, #tpu.memory_space<vmem>>) attributes {dimension_semantics = [#tpu.dimension_semantics<parallel>, #tpu.dimension_semantics<parallel>], iteration_bounds = array<i64: 2, 2>, scalar_prefetch = 0 : i64, scratch_operands = 0 : i64, tpu.core_type = #tpu.core_type<tc>, window_params = [{transform_indices = @transform_0, window_bounds = array<i64: 1, 8, 512>}, {pipeline_mode = #tpu.pipeline_mode<synchronous>, transform_indices = @transform_1, window_bounds = array<i64: 16, 8>}, {pipeline_mode = #tpu.pipeline_mode<synchronous>, transform_indices = @transform_2, window_bounds = array<i64: 16, 1>}, {transform_indices = @transform_3, window_bounds = array<i64: 1, 16, 512>}, {transform_indices = @transform_4, window_bounds = array<i64: 1, 16, 512>}]} {
    %c0 = arith.constant 0 : index
    %c0_0 = arith.constant 0 : index
    %0 = vector.load %arg3[%c0, %c0_0] : memref<16x8xbf16, #tpu.memory_space<vmem>>, vector<16x8xbf16>
    %c0_1 = arith.constant 0 : index
    %c0_2 = arith.constant 0 : index
    %c0_3 = arith.constant 0 : index
    %1 = vector.load %arg2[%c0_1, %c0_2, %c0_3] : memref<1x8x512xf32, #tpu.memory_space<vmem>>, vector<1x8x512xf32>
    %2 = vector.shape_cast %1 : vector<1x8x512xf32> to vector<8x512xf32>
    %3 = arith.truncf %2 : vector<8x512xf32> to vector<8x512xbf16>
    %cst = arith.constant dense<0.000000e+00> : vector<16x512xf32>
    %4 = tpu.matmul %0, %3, %cst {dimension_numbers = #tpu.dot_dimension_numbers<[1], [0], [0], [1], [0, 0, 1, 1], [], []>} : vector<16x8xbf16>, vector<8x512xbf16>, vector<16x512xf32> -> vector<16x512xf32>
    %c0_4 = arith.constant 0 : index
    %c0_5 = arith.constant 0 : index
    %5 = vector.load %arg4[%c0_4, %c0_5] : memref<16x1xf32, #tpu.memory_space<vmem>>, vector<16x1xf32>
    %6 = vector.broadcast %5 : vector<16x1xf32> to vector<16x512xf32>
    %7 = arith.addf %4, %6 : vector<16x512xf32>
    %c0_6 = arith.constant 0 : index
    %c0_7 = arith.constant 0 : index
    %c0_8 = arith.constant 0 : index
    %8 = vector.load %arg5[%c0_6, %c0_7, %c0_8] : memref<1x16x512xf32, #tpu.memory_space<vmem>>, vector<1x16x512xf32>
    %9 = vector.shape_cast %8 : vector<1x16x512xf32> to vector<16x512xf32>
    %10 = arith.addf %7, %9 : vector<16x512xf32>
    %c0_9 = arith.constant 0 : index
    %c0_10 = arith.constant 0 : index
    %c0_11 = arith.constant 0 : index
    %11 = vector.load %arg6[%c0_9, %c0_10, %c0_11] : memref<1x16x512xf32, #tpu.memory_space<vmem>>, vector<1x16x512xf32>
    %12 = vector.shape_cast %11 : vector<1x16x512xf32> to vector<16x512xf32>
    %13 = vector.shape_cast %10 : vector<16x512xf32> to vector<1x16x512xf32>
    tpu.vector_store %arg6[%c0_9, %c0_10, %c0_11], %13 {strides = array<i32>} : memref<1x16x512xf32, #tpu.memory_space<vmem>>, vector<1x16x512xf32>,
    return
  }
  func.func @transform_0(%arg0: i32, %arg1: i32) -> (i32, i32, i32) {
    %c0_i32 = arith.constant 0 : i32
    %c0_i32_0 = arith.constant 0 : i32
    return %arg0, %c0_i32, %arg1 : i32, i32, i32
  }
  func.func @transform_1(%arg0: i32, %arg1: i32) -> (i32, i32) {
    %c0_i32 = arith.constant 0 : i32
    %c0_i32_0 = arith.constant 0 : i32
    %c0_i32_1 = arith.constant 0 : i32
    return %c0_i32, %c0_i32_0 : i32, i32
  }
  func.func @transform_2(%arg0: i32, %arg1: i32) -> (i32, i32) {
    %c0_i32 = arith.constant 0 : i32
    %c0_i32_0 = arith.constant 0 : i32
    %c0_i32_1 = arith.constant 0 : i32
    return %c0_i32, %c0_i32_0 : i32, i32
  }
  func.func @transform_3(%arg0: i32, %arg1: i32) -> (i32, i32, i32) {
    %c0_i32 = arith.constant 0 : i32
    %c0_i32_0 = arith.constant 0 : i32
    return %arg0, %c0_i32, %arg1 : i32, i32, i32
  }
  func.func @transform_4(%arg0: i32, %arg1: i32) -> (i32, i32, i32) {
    %c0_i32 = arith.constant 0 : i32
    %c0_i32_0 = arith.constant 0 : i32
    return %arg0, %c0_i32, %arg1 : i32, i32, i32
  }
}

</mosaic_0001>

<bundles_post_ra>
// kernel: safpn_forward.4
= control target key start
LH: loop header
LB: loop body
LE: loop exit
PB: predicated region body
PF: predicated region fallthrough
CT: control target
= control target key end

     0   :  { %s767_s18 = smov 0   ;;  %s859_s0 = inlined_call_operand.vmem [shape: f32[2,32,16], index: 0, kind: input, shape index: {}]   ;;  %s860_s1 = inlined_call_operand.vmem [shape: bf16[40,32], index: 1, kind: input, shape index: {}]   ;;  %s861_s2 = inlined_call_operand.vmem [shape: f32[40,1], index: 2, kind: input, shape index: {}]   ;;  %s862_s3 = inlined_call_operand.vmem [shape: bf16[16,64], index: 3, kind: input, shape index: {}]   ;;  %s863_s4 = inlined_call_operand.vmem [shape: f32[16,1], index: 4, kind: input, shape index: {}]   ;;  %s864_s5 = inlined_call_operand.vmem [shape: f32[2,16,16], index: 5, kind: output, shape index: {}]  }
   0x1 LB: > { %s621_s19 = sadd.s32 4294967295, %s732_s18   ;;  %p625_p0 = scmp.ge.s32.totalorder %s732_s18, 1  ;;  %s732_s18 = sphi %s767_s18, %s15_s18  }
   0x2   : > { %p187_p1 = scmp.lt.s32.totalorder %s732_s18, 3 }
   0x4   : > { %p188_p2 = pnand %p625_p0, %p187_p1 }
   0x5   : > { %p215_p3 = scmp.lt.s32.totalorder (!%p188_p2), %s621_s19, 1  ;;  %v734_v0 = vmov (!%p188_p2), 0.0   ;;  %vm735_vm0 = vmmov (!%p188_p2), 0   ;;  %v237_v1 = vld [vmem:[%s861_s2] sm:$0xff] (!%p188_p2)  ;;  %v736_v2 = vmov (!%p188_p2), 0   ;;  %vm280_vm1 = vcmask (!%p188_p2), 261120  }
   0x6   : > { %191 = sbr.rel (%p188_p2) target bundleno = 1334 (0x536), region = 40  ;;  %660 = vmatprep.subr.bf16.mxu0 (!%p188_p2), %v734_v0  ;;  %664 = vmatprep.mubr.msk.bf16.mxu0 (!%p188_p2), %vm735_vm0, %v734_v0  ;;  %v714_v9 = vld [vmem:[%s860_s1] sm:$0xff] (!%p188_p2)   ;;  %v715_v10 = vld [vmem:[%s860_s1 + $0x8] sm:$0xff] (!%p188_p2)   ;;  %vm369_vm2 = vcmask (!%p188_p2), 1041408   ;;  %v240_v22 = vld [vmem:[%s861_s2 + $0x18] sm:$0xff] (!%p188_p2)  ;;  %vm365_vm3 = vcmask (!%p188_p2), 31744  }
   0x7   : > { %712 = vset.pattern.permute.xlu0 (!%p188_p2), %v736_v2  ;;  %676 = vmatprep.subr.bf16.mxu1 (!%p188_p2), %v734_v0  ;;  %v503_v25 = vld [vmem:[%s863_s4 + $0x8] sm:$0xff] (!%p188_p2)  ;;  %v716_v27 = vld [vmem:[%s860_s1 + $0x10] ss:$0 sps:$4 sm:$0xff] (!%p188_p2)   ;;  %vm414_vm4 = vcmask (!%p188_p2), 130048   ;;  %v241_v51 = vld [vmem:[%s861_s2 + $0x20] sm:$0xff] (!%p188_p2)  ;;  %vm519_vm5 = vcmask (!%p188_p2), 523264  }
   0x8   : > { %244 = vperm.xlu0 (!%p188_p2), %712, %v237_v1   ;;  %678 = vmatprep.mubr.msk.bf16.mxu1 (!%p188_p2), %vm735_vm0, %v734_v0  ;;  %v238_v34 = vld [vmem:[%s861_s2 + $0x8] sm:$0xff] (!%p188_p2)  ;;  %v239_v35 = vld [vmem:[%s861_s2 + $0x10] sm:$0xff] (!%p188_p2)  ;;  %v502_v53 = vld [vmem:[%s863_s4] sm:$0xff] (!%p188_p2) }
   0x9   : > { %713 = vset.pattern.permute.xlu1 (!%p188_p2), %v736_v2 }
   0xd   : > { %s866_s19 = smov (!%p215_p3, %s621_s19), 1 }
   0xe   : > { %s643_s22 = sshll.u32 %s866_s19, 5  ;;  %s644_s23 = sshll.u32 %s866_s19, 4 }
   0xf   : > { %s219_s25 = scalar_lea.vmem %s859_s0, %s643_s22  ;;  %s224_s26 = scalar_lea.vmem %s864_s5, %s644_s23 }
  0x10   : > { %v226_v3 = vld [vmem:[%s219_s25] sm:$0xff]  ;;  %v227_v4 = vld [vmem:[%s219_s25 + $0x8] sm:$0xff]  ;;  %v228_v5 = vld [vmem:[%s219_s25 + $0x10] sm:$0xff] }
  0x11   : > { %v790_v6 = vpack.c.bf16 %v227_v4, %v226_v3  ;;  %v229_v7 = vld [vmem:[%s219_s25 + $0x18] sm:$0xff] }
  0x12   : > { %v793_v8 = vpack.c.bf16 %v229_v7, %v228_v5 }
  0x13   : > { %661 = vmatpush3.bf16.msra.mxu0 %v790_v6 }
  0x14   : > { %662 = vmatprep.subr.bf16.mxu0 %v734_v0 }
  0x17   : > { %663 = vmatpush3.bf16.msra.mxu0 %v793_v8 }
  0x1a   : > { %665 = vmatmul.mubr.msk.bf16.vlgmr.msra.gmra.mrb[0].mxu0 %vm280_vm1, %v714_v9 }
  0x1b   : > { %668 = vmatprep.mubr.msk.bf16.mxu0 %vm735_vm0, %v734_v0 }
  0x22   : > { %669 = vmatmul.mubr.msk.bf16.gmra.mrb[4].mxu0 %vm280_vm1, %v715_v10 }
  0x23   : > { %672 = vmatprep.mubr.msk.bf16.mxu0 %vm735_vm0, %v734_v0 }
  0x2a   : > { %673 = vmatmul.mubr.msk.bf16.gmra.mrb[8].mxu0 %vm280_vm1, %v716_v27 }
  0x87   : > { %v245_v11 = vpop.permute.xlu0 %244 }
  0xed   : > { %v324_v12 = vpop.f32.mrb[0].mxu0 }
  0xee   : > { %v325_v13 = vadd.f32 %v324_v12, %v245_v11  ;;  %v666_v14 = vpop.f32.mrb[1].mxu0 }
  0xef   : > { %v327_v15 = vpop.f32.mrb[2].mxu0 }
  0xf0   : > { %v346_v16 = vpack.c.bf16 %v325_v13, %v325_v13  ;;  %v667_v17 = vpop.f32.mrb[3].mxu0 }
  0xf2   : > { %347 = vxpose.xlu0.c.b16.start.end [1/1] (short) (narrow) %v346_v16, 16  ;;  %v364_v18 = vrot.slane %v346_v16, 2 }
  0xf4   : > { %v371_v19 = vsel %vm369_vm2, %v364_v18, 0 }
  0xf5   : > { %677 = vmatpush3.bf16.msra.mxu1 %v371_v19  ;;  %v332_v20 = vpop.f32.mrb[4].mxu0 }
  0xf6   : > { %v670_v21 = vpop.f32.mrb[5].mxu0 }
  0xf7   : > { %v335_v23 = vpop.f32.mrb[6].mxu0 }
  0xf8   : > { %v671_v24 = vpop.f32.mrb[7].mxu0 }
  0xfb   : > { %259 = vperm.xlu0 %712, %v240_v22  }
  0xfd   : > { %v340_v52 = vpop.f32.mrb[8].mxu0 }
  0xfe   : > { %v674_v54 = vpop.f32.mrb[9].mxu0 }
  0xff   : > { %511 = vperm.xlu0 %712, %v503_v25   ;;  %v343_v55 = vpop.f32.mrb[10].mxu0 }
 0x100   : > { %v675_v56 = vpop.f32.mrb[11].mxu0 }
 0x158   : > { %v355_v26 = vpop.trf.xlu0 }
 0x159   : > { %679 = vmatmul.mubr.msk.bf16.vlgmr.msra.gmra.mrb[0].mxu1 %vm365_vm3, %v355_v26 }
 0x17a   : > { %v260_v59 = vpop.permute.xlu0 %259 }
 0x17b   : > { %v336_v61 = vadd.f32 %v335_v23, %v260_v59 }
 0x22c   : > { %v407_v28 = vpop.f32.mrb[0].mxu1 }
 0x22d   : > { %v680_v29 = vpop.f32.mrb[1].mxu1  ;;  %v415_v30 = vsel %vm414_vm4, %v407_v28, -inf }
 0x22e   : > { %416 = vmax.xlane.f32.xlu1 %v415_v30  ;;  %v410_v31 = vpop.f32.mrb[2].mxu1 }
 0x22f   : > { %v681_v32 = vpop.f32.mrb[3].mxu1  ;;  %v418_v33 = vsel %vm414_vm4, %v410_v31, -inf }
 0x232   : > { %419 = vmax.xlane.f32.xlu1 %v418_v33 }
 0x243   : > { %249 = vperm.xlu1 %713, %v238_v34  }
 0x247   : > { %254 = vperm.xlu1 %713, %v239_v35  }
 0x2bb   : > { %v417_v36 = vpop.xlane.xlu1 %416 }
 0x2bc   : > { %v421_v37 = vsub.f32 %v407_v28, %v417_v36 }
 0x2be   : > { %v423_v38 = vmul.f32 1.442695, %v421_v37 }
 0x2bf   : > { %v420_v39 = vpop.xlane.xlu1 %419 }
 0x2c0   : > { %718 = vpow2.f32 %v423_v38  ;;  %v422_v40 = vsub.f32 %v410_v31, %v420_v39 }
 0x2c2   : > { %v425_v41 = vmul.f32 1.442695, %v422_v40 }
 0x2c3   : > { %v250_v42 = vpop.permute.xlu1 %249 }
 0x2c4   : > { %720 = vpow2.f32 %v425_v41  ;;  %v328_v44 = vadd.f32 %v327_v15, %v250_v42  ;;  %v717_v15 = vld [vmem:[%s862_s3] sm:$0xff]  }
 0x2c7   : > { %v255_v43 = vpop.permute.xlu1 %254 }
 0x2c8   : > { %v333_v45 = vadd.f32 %v332_v20, %v255_v43 }
 0x2ca   : > { %v719_v46 = vpop.eup %718  ;;  %v437_v47 = vpack.c.bf16 %v333_v45, %v328_v44 }
 0x2cb   : > { %v427_v48 = vsel %vm414_vm4, %v719_v46, 0.0 }
 0x2cc   : > { %428 = vadd.xlane.f32.xlu1 %v427_v48  ;;  %684 = vmatprep.mubr.msk.bf16.mxu1 %vm414_vm4, %v437_v47 }
 0x2ce   : > { %v721_v49 = vpop.eup %720 }
 0x2cf   : > { %v430_v50 = vsel %vm414_vm4, %v721_v49, 0.0 }
 0x2d0   : > { %431 = vadd.xlane.f32.xlu1 %v430_v50 }
 0x2e1   : > { %264 = vperm.xlu1 %713, %v241_v51  }
 0x2e5   : > { %506 = vperm.xlu1 %713, %v502_v53  }
 0x359   : > { %v429_v57 = vpop.xlane.xlu1 %428 }
 0x35a   : > { %722 = vrcp.f32 %v429_v57 }
 0x35d   : > { %v432_v58 = vpop.xlane.xlu1 %431 }
 0x35e   : > { %724 = vrcp.f32 %v432_v58 }
 0x361   : > { %v265_v60 = vpop.permute.xlu1 %264 }
 0x362   : > { %v341_v62 = vadd.f32 %v340_v52, %v265_v60 }
 0x364   : > { %v438_v63 = vpack.c.bf16 %v341_v62, %v336_v61  ;;  %v723_v1 = vpop.eup %722 }
 0x365   : > { %v435_v3 = vmul.f32 %v723_v1, %v719_v46  ;;  %v507_v16 = vpop.permute.xlu1 %506 }
 0x368   : > { %v725_v2 = vpop.eup %724 }
 0x369   : > { %v436_v4 = vmul.f32 %v725_v2, %v721_v49 }
 0x36b   : > { %v439_v5 = vpack.c.bf16 %v436_v4, %v435_v3 }
 0x36d   : > { %700 = vmatprep.subr.msk.bf16.mxu1 %vm414_vm4, %v439_v5  ;;  %v447_v7 = vsel %vm414_vm4, %v439_v5, 0 }
 0x36e   : > { %683 = vmatpush3.bf16.xpose.msra.mxu1 %v447_v7 }
 0x36f   : > { %688 = vmatprep.subr.bf16.mxu1 %v734_v0 }
 0x375   : > { %685 = vmatmul.mubr.msk.bf16.vlgmr.msra.gmra.mrb[4].mxu1 %vm414_vm4, %v438_v63 }
 0x376   : > { %696 = vmatprep.mubr.msk.bf16.mxu1 %vm735_vm0, %v734_v0 }
 0x448   : > { %v686_v9 = vpop.f32.mrb[4].mxu1 }
 0x449   : > { %v483_v10 = vpop.f32.mrb[5].mxu1 }
 0x44a   : > { %v687_v11 = vpop.f32.mrb[6].mxu1 }
 0x44b   : > { %v499_v12 = vpack.c.bf16 %v687_v11, %v686_v9  ;;  %v486_v13 = vpop.f32.mrb[7].mxu1 }
 0x44c   : > { %v498_v14 = vpack.c.bf16 %v486_v13, %v483_v10 }
 0x44e   : > { %689 = vmatpush3.bf16.msra.mxu1 %v498_v14 }
 0x44f   : > { %690 = vmatprep.subr.bf16.mxu1 %v734_v0 }
 0x452   : > { %691 = vmatpush3.bf16.msra.mxu1 %v499_v12 }
 0x453   : > { %692 = vmatprep.subr.bf16.mxu1 %v734_v0 }
 0x456   : > { %693 = vmatpush3.bf16.msra.mxu1 %v790_v6  ;;  %v512_v6 = vpop.permute.xlu0 %511 }
 0x457   : > { %694 = vmatprep.subr.bf16.mxu1 %v734_v0 }
 0x45a   : > { %695 = vmatpush3.bf16.msra.mxu1 %v793_v8 }
 0x45d   : > { %697 = vmatmul.mubr.msk.bf16.vlgmr.msra.gmra.mrb[8].mxu1 %vm519_vm5, %v717_v15 }
 0x530   : > { %v557_v17 = vpop.f32.mrb[8].mxu1 }
 0x531   : > { %v558_v18 = vadd.f32 %v557_v17, %v507_v16  ;;  %v698_v19 = vpop.f32.mrb[9].mxu1 }
 0x532   : > { %v560_v20 = vpop.f32.mrb[10].mxu1 }
 0x533   : > { %564 = vst.msk [vmem:[%s224_s26] sm:$0xff] %vm414_vm4, %v558_v18  ;;  %v561_v0 = vadd.f32 %v560_v20, %v512_v6  ;;  %v699_v21 = vpop.f32.mrb[11].mxu1 }
 0x535   : > { %565 = vst.msk [vmem:[%s224_s26 + $0x8] sm:$0xff] %vm414_vm4, %v561_v0 }
 0x536 PF: > { %s15_s18 = sadd.s32 1, %s732_s18  }
 0x537   : > { %p12_p4 = scmp.ge.s32.totalorder %s15_s18, 4  }
 0x539   :  { %14 = sbr.rel (!%p12_p4) target bundleno = 1 (0x1), region = 70 }

// kernel: safpn_forward.5
= control target key start
LH: loop header
LB: loop body
LE: loop exit
PB: predicated region body
PF: predicated region fallthrough
CT: control target
= control target key end

     0   :  { %s1001_s27 = smov 0   ;;  %s1093_s0 = inlined_call_operand.vmem [shape: f32[2,24,16], index: 0, kind: input, shape index: {}]   ;;  %s1094_s1 = inlined_call_operand.vmem [shape: bf16[16,64], index: 1, kind: input, shape index: {}]   ;;  %s1095_s2 = inlined_call_operand.vmem [shape: f32[2,24,64], index: 2, kind: input, shape index: {}]   ;;  %s1096_s3 = inlined_call_operand.vmem [shape: bf16[30,24], index: 3, kind: input, shape index: {}]   ;;  %s1097_s4 = inlined_call_operand.vmem [shape: f32[30,1], index: 4, kind: input, shape index: {}]   ;;  %s1098_s5 = inlined_call_operand.vmem [shape: bf16[16,48], index: 5, kind: input, shape index: {}]   ;;  %s1099_s6 = inlined_call_operand.vmem [shape: f32[16,1], index: 6, kind: input, shape index: {}]   ;;  %s1100_s7 = inlined_call_operand.vmem [shape: f32[2,16,64], index: 7, kind: input, shape index: {}]   ;;  %s1101_s8 = inlined_call_operand.vmem [shape: f32[2,16,64], index: 8, kind: output, shape index: {}]  }
   0x1 LB: > { %s836_s28 = sadd.s32 4294967295, %s950_s27   ;;  %p840_p0 = scmp.ge.s32.totalorder %s950_s27, 1  ;;  %s950_s27 = sphi %s1001_s27, %s18_s27  }
   0x2   : > { %p282_p1 = scmp.lt.s32.totalorder %s950_s27, 3 }
   0x4   : > { %p283_p2 = pnand %p840_p0, %p282_p1 }
   0x5   : > { %p326_p3 = scmp.lt.s32.totalorder (!%p283_p2), %s836_s28, 1  ;;  %v932_v0 = vld [vmem:[%s1096_s3] sm:$0xff] (!%p283_p2)   ;;  %vm393_vm0 = vcmask (!%p283_p2), 195584   ;;  %v952_v2 = vmov (!%p283_p2), 0   ;;  %vm400_vm1 = vcmask (!%p283_p2), 1043456   ;;  %v953_v10 = vmov (!%p283_p2), 0.0  }
   0x6   : > { %286 = sbr.rel (%p283_p2) target bundleno = 1553 (0x611), region = 52  ;;  %v359_v1 = vld [vmem:[%s1097_s4] sm:$0xff] (!%p283_p2)  ;;  %883 = vmatprep.mubr.msk.bf16.mxu0 (!%p283_p2), %vm393_vm0, %v932_v0  ;;  %930 = vset.pattern.permute.xlu0 (!%p283_p2), %v952_v2  ;;  %v933_v9 = vld [vmem:[%s1096_s3 + $0x8] sm:$0x7f] (!%p283_p2)   ;;  %vm954_vm2 = vmmov (!%p283_p2), 0   ;;  %vm482_vm3 = vcmask (!%p283_p2), 1040384  }
   0x7   : > { %365 = vperm.xlu0 (!%p283_p2), %930, %v359_v1   ;;  %931 = vset.pattern.permute.xlu1 (!%p283_p2), %v952_v2  ;;  %vm483_vm4 = vcmask (!%p283_p2), 1041408   ;;  %v955_v20 = vmov (!%p283_p2), 65535   ;;  %v362_v27 = vld [vmem:[%s1097_s4 + $0x18] sm:$0x3f] (!%p283_p2)  ;;  %vm478_vm5 = vcmask (!%p283_p2), 23552   ;;  %vm530_vm6 = vcmask (!%p283_p2), 130048  }
   0x8   : > { %887 = vmatprep.subr.bf16.mxu1 (!%p283_p2), %v953_v10  ;;  %889 = vmatprep.mubr.msk.bf16.mxu1 (!%p283_p2), %vm954_vm2, %v953_v10  ;;  %v484_v21 = vsel (!%p283_p2), %vm482_vm3, 4294967295, %v955_v20  ;;  %v360_v35 = vld [vmem:[%s1097_s4 + $0x8] sm:$0xff] (!%p283_p2)  ;;  %v361_v46 = vld [vmem:[%s1097_s4 + $0x10] sm:$0xff] (!%p283_p2)  ;;  %v688_v47 = vld [vmem:[%s1099_s6] sm:$0xff] (!%p283_p2)  ;;  %vm558_vm7 = vcmask (!%p283_p2), 1044480   ;;  %vm705_vm8 = vcmask (!%p283_p2), 392192  }
   0x9   : > { %v485_v24 = vsel (!%p283_p2), %vm483_vm4, %v484_v21, 0  ;;  %v689_v48 = vld [vmem:[%s1099_s6 + $0x8] sm:$0xff] (!%p283_p2)  ;;  %v934_v49 = vld [vmem:[%s1094_s1] sm:$0xff] (!%p283_p2)   ;;  %vm754_vm9 = vcmask (!%p283_p2), 523264  }
   0xd   : > { %s1103_s28 = smov (!%p326_p3, %s836_s28), 1 }
   0xe   : > { %s917_s11 = smul.u32 24, %s1103_s28 }
  0x10   : > { %s330_s14 = scalar_lea.vmem %s1093_s0, %s917_s11  ;;  %s335_s12 = scalar_lea.vmem %s1095_s2, %s917_s11 }
  0x11   : > { %v350_v3 = vld [vmem:[%s330_s14] sm:$0xff]  ;;  %v351_v4 = vld [vmem:[%s330_s14 + $0x8] sm:$0xff]  ;;  %v352_v5 = vld [vmem:[%s330_s14 + $0x10] sm:$0xff]  ;;  %s861_s11 = sshll.u32 %s1103_s28, 4 }
  0x12   : > { %v357_v6 = vpack.c.bf16 %v351_v4, %v350_v3  ;;  %v358_v7 = vpack.c.bf16 %v352_v5, %v352_v5  ;;  %s340_s17 = scalar_lea.vmem %s1100_s7, %s861_s11  ;;  %s345_s20 = scalar_lea.vmem %s1101_s8, %s861_s11 }
  0x14   : > { %879 = vmatprep.subr.bf16.mxu0 %v357_v6  ;;  %v402_v8 = vsel %vm400_vm1, %v358_v7, 0 }
  0x15   : > { %880 = vmatpush3.bf16.msra.mxu0 %v357_v6 }
  0x16   : > { %915 = vmatprep.subr.msk.bf16.mxu0 %vm400_vm1, %v358_v7 }
  0x19   : > { %882 = vmatpush3.bf16.msra.mxu0 %v402_v8 }
  0x1a   : > { %899 = vmatprep.subr.bf16.mxu0 %v934_v49 }
  0x1c   : > { %884 = vmatmul.mubr.msk.bf16.vlgmr.msra.gmra.mrb[0].mxu0 %vm393_vm0, %v933_v9 }
  0x1d   : > { %900 = vmatpush3.bf16.msra.mxu0 %v934_v49 }
  0x86   : > { %v366_v11 = vpop.permute.xlu0 %365 }
  0xef   : > { %v1031_v12 = vpop.f32.mrb[0].mxu0 }
  0xf0   : > { %v438_v13 = vpop.f32.mrb[1].mxu0 }
  0xf1   : > { %v1033_v14 = vadd.f32 %v438_v13, %v366_v11  ;;  %v1035_v15 = vpop.f32.mrb[2].mxu0 }
  0xf2   : > { %v441_v16 = vpop.f32.mrb[3].mxu0 }
  0xf3   : > { %v453_v17 = vpack.c.bf16 %v1033_v14, %v1033_v14 }
  0xf5   : > { %454 = vxpose.xlu0.c.b16.start.end [1/1] (short) (narrow) %v453_v17, 16  ;;  %v471_v18 = vshrl.u32 %v453_v17, 16  ;;  %v474_v19 = vshll.u32 %v453_v17, 16  ;;  %v347_v17 = vld [vmem:[%s335_s12] sm:$0xff] }
  0xf7   : > { %v473_v22 = vrot.slane %v471_v18, 1  ;;  %v476_v23 = vrot.slane %v474_v19, 2  ;;  %v348_v18 = vld [vmem:[%s335_s12 + $0x8] sm:$0xff]  ;;  %v349_v19 = vld [vmem:[%s335_s12 + $0x10] sm:$0xff] }
  0xf8   : > { %v685_v21 = vpack.c.bf16 %v349_v19, %v348_v18 }
  0xf9   : > { %v477_v25 = vor.u32 %v476_v23, %v473_v22  ;;  %v935_v22 = vld [vmem:[%s1098_s5] sm:$0xff]  }
  0xfb   : > { %v487_v26 = vand.u32 %v485_v24, %v477_v25  ;;  %v750_v25 = vld [vmem:[%s340_s17] sm:$0xff] }
  0xfd   : > { %888 = vmatpush3.bf16.msra.mxu1 %v487_v26 }
  0xfe   : > { %380 = vperm.xlu0 %930, %v362_v27  }
 0x15b   : > { %v462_v28 = vpop.trf.xlu0 }
 0x15c   : > { %890 = vmatmul.mubr.msk.bf16.vlgmr.msra.gmra.mrb[0].mxu1 %vm478_vm5, %v462_v28 }
 0x17d   : > { %v381_v54 = vpop.permute.xlu0 %380 }
 0x17e   : > { %v450_v56 = vadd.f32 %v1035_v15, %v381_v54 }
 0x22f   : > { %v523_v29 = vpop.f32.mrb[0].mxu1 }
 0x230   : > { %v891_v30 = vpop.f32.mrb[1].mxu1  ;;  %v531_v31 = vsel %vm530_vm6, %v523_v29, -inf }
 0x231   : > { %532 = vmax.xlane.f32.xlu1 %v531_v31  ;;  %v526_v32 = vpop.f32.mrb[2].mxu1 }
 0x232   : > { %v892_v33 = vpop.f32.mrb[3].mxu1  ;;  %v534_v34 = vsel %vm530_vm6, %v526_v32, -inf }
 0x235   : > { %535 = vmax.xlane.f32.xlu1 %v534_v34 }
 0x246   : > { %370 = vperm.xlu1 %931, %v360_v35  }
 0x2be   : > { %v533_v36 = vpop.xlane.xlu1 %532 }
 0x2bf   : > { %v537_v37 = vsub.f32 %v523_v29, %v533_v36  ;;  %v751_v29 = vld [vmem:[%s340_s17 + $0x8] sm:$0xff] }
 0x2c1   : > { %v539_v38 = vmul.f32 1.442695, %v537_v37 }
 0x2c2   : > { %v536_v39 = vpop.xlane.xlu1 %535 }
 0x2c3   : > { %936 = vpow2.f32 %v539_v38  ;;  %v538_v40 = vsub.f32 %v526_v32, %v536_v39 }
 0x2c5   : > { %v541_v41 = vmul.f32 1.442695, %v538_v40 }
 0x2c6   : > { %v371_v50 = vpop.permute.xlu1 %370 }
 0x2c7   : > { %938 = vpow2.f32 %v541_v41  ;;  %v442_v53 = vadd.f32 %v441_v16, %v371_v50 }
 0x2c9   : > { %v553_v57 = vpack.c.bf16 %v442_v53, %v1033_v14 }
 0x2cb   : > { %v559_v61 = vrot.slane %v553_v57, 3 }
 0x2cd   : > { %v937_v42 = vpop.eup %936 }
 0x2ce   : > { %v543_v43 = vsel %vm530_vm6, %v937_v42, 0.0 }
 0x2cf   : > { %544 = vadd.xlane.f32.xlu1 %v543_v43 }
 0x2d1   : > { %v939_v44 = vpop.eup %938 }
 0x2d2   : > { %v546_v45 = vsel %vm530_vm6, %v939_v44, 0.0 }
 0x2d3   : > { %547 = vadd.xlane.f32.xlu1 %v546_v45 }
 0x2e4   : > { %375 = vperm.xlu1 %931, %v361_v46  }
 0x2e8   : > { %692 = vperm.xlu1 %931, %v688_v47  }
 0x2ec   : > { %697 = vperm.xlu1 %931, %v689_v48  }
 0x35c   : > { %v545_v51 = vpop.xlane.xlu1 %544 }
 0x35d   : > { %940 = vrcp.f32 %v545_v51 }
 0x360   : > { %v548_v52 = vpop.xlane.xlu1 %547 }
 0x361   : > { %942 = vrcp.f32 %v548_v52 }
 0x364   : > { %v376_v55 = vpop.permute.xlu1 %375 }
 0x365   : > { %v447_v58 = vadd.f32 %v1031_v12, %v376_v55 }
 0x367   : > { %v554_v59 = vpack.c.bf16 %v450_v56, %v447_v58  ;;  %v941_v60 = vpop.eup %940 }
 0x368   : > { %v551_v1 = vmul.f32 %v941_v60, %v937_v42  ;;  %v693_v23 = vpop.permute.xlu1 %692 }
 0x369   : > { %v560_v62 = vrot.slane %v554_v59, 3 }
 0x36b   : > { %v943_v63 = vpop.eup %942  ;;  %v561_v0 = vsel %vm558_vm7, %v559_v61, %v560_v62 }
 0x36c   : > { %895 = vmatprep.mubr.msk.bf16.mxu1 %vm530_vm6, %v561_v0  ;;  %v552_v2 = vmul.f32 %v943_v63, %v939_v44  ;;  %v698_v28 = vpop.permute.xlu1 %697 }
 0x36e   : > { %v555_v3 = vpack.c.bf16 %v552_v2, %v551_v1 }
 0x370   : > { %916 = vmatprep.subr.msk.bf16.mxu1 %vm530_vm6, %v555_v3  ;;  %v569_v4 = vsel %vm530_vm6, %v555_v3, 0 }
 0x371   : > { %894 = vmatpush3.bf16.xpose.msra.mxu1 %v569_v4 }
 0x372   : > { %905 = vmatprep.subr.bf16.mxu1 %v953_v10 }
 0x378   : > { %896 = vmatmul.mubr.msk.bf16.vlgmr.msra.gmra.mrb[4].mxu1 %vm530_vm6, %v560_v62 }
 0x379   : > { %911 = vmatprep.mubr.msk.bf16.mxu1 %vm954_vm2, %v953_v10 }
 0x44b   : > { %v897_v5 = vpop.f32.mrb[4].mxu1 }
 0x44c   : > { %v605_v6 = vpop.f32.mrb[5].mxu1  ;;  %v620_v11 = vpack.c.bf16 %v897_v5, %v897_v5 }
 0x44d   : > { %v898_v7 = vpop.f32.mrb[6].mxu1 }
 0x44e   : > { %v608_v8 = vpop.f32.mrb[7].mxu1 }
 0x44f   : > { %v619_v9 = vpack.c.bf16 %v608_v8, %v605_v6 }
 0x451   : > { %901 = vmatprep.mubr.msk.bf16.mxu0 %vm530_vm6, %v619_v9 }
 0x452   : > { %902 = vmatmul.mubr.msk.bf16.vlgmr.msra.gmra.mrb[4].mxu0 %vm530_vm6, %v620_v11 }
 0x525   : > { %v903_v12 = vpop.f32.mrb[4].mxu0 }
 0x526   : > { %v669_v13 = vpop.f32.mrb[5].mxu0  ;;  %v684_v20 = vpack.c.bf16 %v347_v17, %v903_v12 }
 0x527   : > { %v904_v14 = vpop.f32.mrb[6].mxu0 }
 0x528   : > { %v672_v15 = vpop.f32.mrb[7].mxu0 }
 0x529   : > { %v683_v16 = vpack.c.bf16 %v672_v15, %v669_v13 }
 0x52b   : > { %906 = vmatpush3.bf16.msra.mxu1 %v683_v16 }
 0x52c   : > { %907 = vmatprep.subr.bf16.mxu1 %v953_v10 }
 0x52f   : > { %908 = vmatpush3.bf16.msra.mxu1 %v684_v20 }
 0x530   : > { %909 = vmatprep.subr.bf16.mxu1 %v953_v10 }
 0x533   : > { %910 = vmatpush3.bf16.msra.mxu1 %v685_v21 }
 0x536   : > { %912 = vmatmul.mubr.msk.bf16.vlgmr.msra.gmra.mrb[8].mxu1 %vm705_vm8, %v935_v22 }
 0x609   : > { %v743_v24 = vpop.f32.mrb[8].mxu1 }
 0x60a   : > { %v744_v26 = vadd.f32 %v743_v24, %v693_v23  ;;  %v913_v27 = vpop.f32.mrb[9].mxu1 }
 0x60b   : > { %v746_v10 = vpop.f32.mrb[10].mxu1 }
 0x60c   : > { %v752_v30 = vadd.f32 %v750_v25, %v744_v26  ;;  %v747_v31 = vadd.f32 %v746_v10, %v698_v28  ;;  %v914_v32 = vpop.f32.mrb[11].mxu1 }
 0x60e   : > { %755 = vst.msk [vmem:[%s345_s20] sm:$0xff] %vm754_vm9, %v752_v30  ;;  %v753_v33 = vadd.f32 %v751_v29, %v747_v31 }
 0x610   : > { %756 = vst.msk [vmem:[%s345_s20 + $0x8] sm:$0xff] %vm754_vm9, %v753_v33 }
 0x611 PF: > { %s18_s27 = sadd.s32 1, %s950_s27  }
 0x612   : > { %p15_p4 = scmp.ge.s32.totalorder %s18_s27, 4  }
 0x614   :  { %17 = sbr.rel (!%p15_p4) target bundleno = 1 (0x1), region = 88 }

// kernel: safpn_forward.6
= control target key start
LH: loop header
LB: loop body
LE: loop exit
PB: predicated region body
PF: predicated region fallthrough
CT: control target
= control target key end

     0   :  { %s1149_s27 = smov 0   ;;  %s1305_s0 = inlined_call_operand.vmem [shape: f32[2,16,64], index: 0, kind: input, shape index: {}]   ;;  %s1306_s1 = inlined_call_operand.vmem [shape: bf16[64,256], index: 1, kind: input, shape index: {}]   ;;  %s1307_s2 = inlined_call_operand.vmem [shape: f32[2,16,256], index: 2, kind: input, shape index: {}]   ;;  %s1308_s3 = inlined_call_operand.vmem [shape: bf16[20,16], index: 3, kind: input, shape index: {}]   ;;  %s1309_s4 = inlined_call_operand.vmem [shape: f32[20,1], index: 4, kind: input, shape index: {}]   ;;  %s1310_s5 = inlined_call_operand.vmem [shape: bf16[16,32], index: 5, kind: input, shape index: {}]   ;;  %s1311_s6 = inlined_call_operand.vmem [shape: f32[16,1], index: 6, kind: input, shape index: {}]   ;;  %s1312_s7 = inlined_call_operand.vmem [shape: f32[2,16,256], index: 7, kind: input, shape index: {}]   ;;  %s1313_s8 = inlined_call_operand.vmem [shape: f32[2,16,256], index: 8, kind: output, shape index: {}]  }
   0x1 LB: > { %s952_s28 = sadd.s32 4294967295, %s1099_s27   ;;  %p956_p0 = scmp.ge.s32.totalorder %s1099_s27, 1  ;;  %s1099_s27 = sphi %s1149_s27, %s18_s27  }
   0x2   : > { %p282_p1 = scmp.lt.s32.totalorder %s1099_s27, 3 }
   0x4   : > { %p283_p2 = pnand %p956_p0, %p282_p1 }
   0x5   : > { %p326_p3 = scmp.lt.s32.totalorder (!%p283_p2), %s952_s28, 1  ;;  %v1046_v0 = vld [vmem:[%s1308_s3] sm:$0xff] (!%p283_p2)   ;;  %vm383_vm0 = vcmask (!%p283_p2), 130048   ;;  %v1101_v2 = vmov (!%p283_p2), 0   ;;  %vm470_vm1 = vcmask (!%p283_p2), 1040384   ;;  %vm457_vm2 = vcmask (!%p283_p2), 15360  }
   0x6   : > { %286 = sbr.rel (%p283_p2) target bundleno = 1589 (0x635), region = 52  ;;  %1006 = vmatprep.mubr.msk.bf16.mxu0 (!%p283_p2), %vm383_vm0, %v1046_v0  ;;  %v357_v1 = vld [vmem:[%s1309_s4] sm:$0xff] (!%p283_p2)  ;;  %1044 = vset.pattern.permute.xlu0 (!%p283_p2), %v1101_v2  ;;  %v1047_v6 = vld [vmem:[%s1308_s3 + $0x8] ss:$0 sps:$4 sm:$0x33] (!%p283_p2)   ;;  %vm539_vm3 = vcmask (!%p283_p2), 523264  }
   0x7   : > { %1045 = vset.pattern.permute.xlu1 (!%p283_p2), %v1101_v2  ;;  %362 = vperm.xlu0 (!%p283_p2), %1044, %v357_v1   ;;  %vm1103_vm4 = vmmov (!%p283_p2), 0   ;;  %vm636_vm5 = vcmask (!%p283_p2), 1045504   ;;  %vm814_vm6 = vcmask (!%p283_p2), 261120  }
   0xd   : > { %s1315_s28 = smov (!%p326_p3, %s952_s28), 1 }
   0xe   : > { %s987_s11 = sshll.u32 %s1315_s28, 4  ;;  %s1285_s21 = sshll.u32 %s1315_s28, 5 }
   0xf   : > { %s330_s14 = scalar_lea.vmem %s1305_s0, %s987_s11  ;;  %s335_s24 = scalar_lea.vmem %s1307_s2, %s1285_s21 }
  0x10   : > { %v351_v3 = vld [vmem:[%s330_s14] sm:$0xff]  ;;  %v352_v4 = vld [vmem:[%s330_s14 + $0x8] sm:$0xff]  ;;  %s340_s30 = scalar_lea.vmem %s1312_s7, %s1285_s21  ;;  %s345_s11 = scalar_lea.vmem %s1313_s8, %s1285_s21 }
  0x11   : > { %v356_v5 = vpack.c.bf16 %v352_v4, %v351_v3 }
  0x13   : > { %1004 = vmatprep.subr.bf16.mxu0 %v356_v5 }
  0x14   : > { %1005 = vmatpush3.bf16.msra.mxu0 %v356_v5 }
  0x17   : > { %1007 = vmatmul.mubr.msk.bf16.vlgmr.msra.gmra.mrb[0].mxu0 %vm383_vm0, %v1047_v6 }
  0x86   : > { %v363_v7 = vpop.permute.xlu0 %362 }
  0xea   : > { %v1176_v8 = vpop.f32.mrb[0].mxu0 }
  0xeb   : > { %v424_v9 = vpop.f32.mrb[1].mxu0 }
  0xec   : > { %v1178_v10 = vadd.f32 %v424_v9, %v363_v7  ;;  %v1009_v11 = vpop.f32.mrb[2].mxu0  ;;  %v358_v7 = vld [vmem:[%s1309_s4 + $0x8] sm:$0xff] }
  0xed   : > { %v1180_v12 = vpop.f32.mrb[3].mxu0 }
  0xee   : > { %v438_v13 = vpack.c.bf16 %v1178_v10, %v1178_v10 }
  0xf0   : > { %439 = vxpose.xlu0.c.b16.start.end [1/1] (short) (narrow) %v438_v13, 64  ;;  %v456_v14 = vrot.slane %v438_v13, 1  ;;  %v798_v13 = vld [vmem:[%s1311_s6 + $0x8] sm:$0xff] }
  0xf2   : > { %1032 = vmatprep.subr.msk.bf16.mxu1 %vm470_vm1, %v456_v14  ;;  %v472_v15 = vsel %vm470_vm1, %v456_v14, 0 }
  0xf3   : > { %1011 = vmatpush3.bf16.msra.mxu1 %v472_v15 }
 0x156   : > { %v447_v16 = vpop.trf.xlu0 }
 0x157   : > { %1012 = vmatprep.mubr.msk.bf16.mxu1 %vm457_vm2, %v447_v16  ;;  %v1102_v16 = vmov 0.0  }
 0x158   : > { %1020 = vmatprep.subr.bf16.mxu0 %v1102_v16  ;;  %1028 = vmatprep.mubr.msk.bf16.mxu0 %vm1103_vm4, %v1102_v16 }
 0x15a   : > { %v448_v17 = vpop.trf.xlu0 }
 0x15b   : > { %1013 = vmatmul.mubr.msk.bf16.vlgmr.msra.gmra.mrb[0].mxu1 %vm457_vm2, %v448_v17 }
 0x15e   : > { %v449_v18 = vpop.trf.xlu0 }
 0x15f   : > { %1016 = vmatprep.mubr.msk.bf16.mxu1 %vm457_vm2, %v449_v18 }
 0x162   : > { %v450_v19 = vpop.trf.xlu0 }
 0x163   : > { %1017 = vmatmul.mubr.msk.bf16.gmra.mrb[4].mxu1 %vm457_vm2, %v450_v19  ;;  %v359_v19 = vld [vmem:[%s1309_s4 + $0x10] sm:$0xf] }
 0x164   : > { %780 = vmatprep.mubr.bf16.mxu1 %v1101_v2 }
 0x22e   : > { %v1014_v20 = vpop.f32.mrb[0].mxu1 }
 0x22f   : > { %v508_v21 = vpop.f32.mrb[1].mxu1  ;;  %v546_v28 = vsel %vm539_vm3, %v1014_v20, -inf }
 0x230   : > { %v1015_v22 = vpop.f32.mrb[2].mxu1  ;;  %v540_v23 = vsel %vm539_vm3, %v508_v21, -inf }
 0x231   : > { %541 = vmax.xlane.f32.xlu1 %v540_v23  ;;  %v511_v24 = vpop.f32.mrb[3].mxu1  ;;  %v549_v31 = vsel %vm539_vm3, %v1015_v22, -inf  ;;  %v1053_v23 = vld [vmem:[%s1306_s1 + $0x14] ss:$8 sps:$4 sm:$0xff]  }
 0x232   : > { %v543_v25 = vsel %vm539_vm3, %v511_v24, -inf }
 0x235   : > { %544 = vmax.xlane.f32.xlu1 %v543_v25  ;;  %v1056_v25 = vld [vmem:[%s1306_s1 + $0x24] ss:$8 sps:$4 sm:$0xff]  }
 0x236   : > { %v1018_v26 = vpop.f32.mrb[4].mxu1 }
 0x237   : > { %v524_v27 = vpop.f32.mrb[5].mxu1  ;;  %v558_v34 = vsel %vm539_vm3, %v1018_v26, -inf }
 0x238   : > { %v1019_v29 = vpop.f32.mrb[6].mxu1  ;;  %v552_v32 = vsel %vm539_vm3, %v524_v27, -inf }
 0x239   : > { %547 = vmax.xlane.f32.xlu1 %v546_v28  ;;  %v527_v30 = vpop.f32.mrb[7].mxu1  ;;  %v561_v35 = vsel %vm539_vm3, %v1019_v29, -inf }
 0x23a   : > { %v555_v33 = vsel %vm539_vm3, %v527_v30, -inf }
 0x23d   : > { %550 = vmax.xlane.f32.xlu1 %v549_v31 }
 0x241   : > { %553 = vmax.xlane.f32.xlu1 %v552_v32 }
 0x245   : > { %556 = vmax.xlane.f32.xlu1 %v555_v33 }
 0x249   : > { %559 = vmax.xlane.f32.xlu1 %v558_v34 }
 0x24d   : > { %562 = vmax.xlane.f32.xlu1 %v561_v35 }
 0x2be   : > { %v542_v36 = vpop.xlane.xlu1 %541 }
 0x2bf   : > { %v564_v37 = vsub.f32 %v508_v21, %v542_v36  ;;  %v1048_v21 = vld [vmem:[%s1306_s1] ss:$8 sps:$4 sm:$0xff]  }
 0x2c1   : > { %v572_v38 = vmul.f32 1.442695, %v564_v37 }
 0x2c2   : > { %v545_v39 = vpop.xlane.xlu1 %544 }
 0x2c3   : > { %1061 = vpow2.f32 %v572_v38  ;;  %v565_v40 = vsub.f32 %v511_v24, %v545_v39  ;;  %v1051_v24 = vld [vmem:[%s1306_s1 + $0x10] ss:$8 sps:$4 sm:$0xff]  }
 0x2c5   : > { %v574_v41 = vmul.f32 1.442695, %v565_v40 }
 0x2c6   : > { %v548_v42 = vpop.xlane.xlu1 %547 }
 0x2c7   : > { %1063 = vpow2.f32 %v574_v41  ;;  %v566_v43 = vsub.f32 %v1014_v20, %v548_v42  ;;  %v797_v20 = vld [vmem:[%s1311_s6] sm:$0xff] }
 0x2c9   : > { %v576_v44 = vmul.f32 1.442695, %v566_v43 }
 0x2ca   : > { %v551_v45 = vpop.xlane.xlu1 %550 }
 0x2cb   : > { %1065 = vpow2.f32 %v576_v44  ;;  %v567_v46 = vsub.f32 %v1015_v22, %v551_v45  ;;  %v1050_v22 = vld [vmem:[%s1306_s1 + $0x4] ss:$8 sps:$4 sm:$0xff]  }
 0x2cc   : > { %748 = vmatprep.subr.bf16.mxu1 %v1050_v22  ;;  %v349_v22 = vld [vmem:[%s335_s24 + $0x10] sm:$0xff] }
 0x2cd   : > { %v1193_v47 = vpop.eup %1061  ;;  %v578_v48 = vmul.f32 1.442695, %v567_v46  ;;  %749 = vmatpush1.bf16.msra.mxu1 %v1048_v21  ;;  %v347_v21 = vld [vmem:[%s335_s24] sm:$0xff] }
 0x2ce   : > { %v554_v49 = vpop.xlane.xlu1 %553  ;;  %v588_v50 = vsel %vm539_vm3, %v1193_v47, 0.0  ;;  %750 = vmatprep.subr.bf16.mxu1 %v1053_v23  ;;  %v1060_v23 = vld [vmem:[%s1310_s5] sm:$0xff]  }
 0x2cf   : > { %1067 = vpow2.f32 %v578_v48  ;;  %589 = vadd.xlane.f32.xlu1 %v588_v50  ;;  %v568_v55 = vsub.f32 %v524_v27, %v554_v49 }
 0x2d1   : > { %v1197_v51 = vpop.eup %1063  ;;  %v580_v60 = vmul.f32 1.442695, %v568_v55  ;;  %751 = vmatpush1.bf16.msra.mxu1 %v1051_v24 }
 0x2d2   : > { %v557_v52 = vpop.xlane.xlu1 %556  ;;  %v591_v53 = vsel %vm539_vm3, %v1197_v51, 0.0  ;;  %752 = vmatprep.subr.bf16.mxu1 %v1056_v25 }
 0x2d3   : > { %592 = vadd.xlane.f32.xlu0 %v591_v53  ;;  %v569_v1 = vsub.f32 %v527_v30, %v557_v52 }
 0x2d5   : > { %v1201_v54 = vpop.eup %1065  ;;  %v582_v4 = vmul.f32 1.442695, %v569_v1  ;;  %v1059_v1 = vld [vmem:[%s1306_s1 + $0x34] ss:$8 sps:$4 sm:$0xff]  }
 0x2d6   : > { %v560_v56 = vpop.xlane.xlu1 %559  ;;  %v594_v57 = vsel %vm539_vm3, %v1201_v54, 0.0 }
 0x2d7   : > { %v570_v58 = vsub.f32 %v1018_v26, %v560_v56  ;;  %595 = vadd.xlane.f32.xlu1 %v594_v57  ;;  %v1054_v26 = vld [vmem:[%s1306_s1 + $0x20] ss:$8 sps:$4 sm:$0xff]  }
 0x2d8   : > { %753 = vmatpush1.bf16.msra.mxu1 %v1054_v26  ;;  %v861_v26 = vld [vmem:[%s340_s30] sm:$0xff] }
 0x2d9   : > { %v1205_v59 = vpop.eup %1067  ;;  %v584_v61 = vmul.f32 1.442695, %v570_v58  ;;  %754 = vmatprep.subr.bf16.mxu1 %v1059_v1 }
 0x2da   : > { %v563_v62 = vpop.xlane.xlu1 %562  ;;  %v597_v63 = vsel %vm539_vm3, %v1205_v59, 0.0 }
 0x2db   : > { %1069 = vpow2.f32 %v584_v61  ;;  %v571_v0 = vsub.f32 %v1019_v29, %v563_v62  ;;  %598 = vadd.xlane.f32.xlu1 %v597_v63 }
 0x2dc   : > { %1071 = vpow2.f32 %v580_v60 }
 0x2dd   : > { %v586_v3 = vmul.f32 1.442695, %v571_v0 }
 0x2df   : > { %1073 = vpow2.f32 %v586_v3  ;;  %v1057_v3 = vld [vmem:[%s1306_s1 + $0x30] ss:$8 sps:$4 sm:$0xff]  }
 0x2e0   : > { %1075 = vpow2.f32 %v582_v4  ;;  %755 = vmatpush1.bf16.msra.mxu1 %v1057_v3 }
 0x2e5   : > { %v1209_v5 = vpop.eup %1069 }
 0x2e6   : > { %v606_v6 = vsel %vm539_vm3, %v1209_v5, 0.0  ;;  %v1216_v9 = vpop.eup %1071 }
 0x2e7   : > { %607 = vadd.xlane.f32.xlu1 %v606_v6  ;;  %v600_v11 = vsel %vm539_vm3, %v1216_v9, 0.0 }
 0x2e9   : > { %367 = vperm.xlu0 %1044, %v358_v7   ;;  %v1223_v14 = vpop.eup %1073 }
 0x2ea   : > { %v609_v15 = vsel %vm539_vm3, %v1223_v14, 0.0  ;;  %v1228_v17 = vpop.eup %1075 }
 0x2eb   : > { %601 = vadd.xlane.f32.xlu1 %v600_v11  ;;  %v603_v18 = vsel %vm539_vm3, %v1228_v17, 0.0 }
 0x2ed   : > { %806 = vperm.xlu0 %1044, %v798_v13  }
 0x2ef   : > { %610 = vadd.xlane.f32.xlu1 %v609_v15  ;;  %v350_v15 = vld [vmem:[%s335_s24 + $0x18] sm:$0xff] }
 0x2f3   : > { %604 = vadd.xlane.f32.xlu1 %v603_v18 }
 0x304   : > { %372 = vperm.xlu1 %1045, %v359_v19  }
 0x308   : > { %801 = vperm.xlu1 %1045, %v797_v20  }
 0x35c   : > { %v590_v27 = vpop.xlane.xlu1 %589 }
 0x35d   : > { %1077 = vrcp.f32 %v590_v27 }
 0x360   : > { %v593_v28 = vpop.xlane.xlu0 %592 }
 0x361   : > { %1079 = vrcp.f32 %v593_v28 }
 0x364   : > { %v596_v29 = vpop.xlane.xlu1 %595 }
 0x365   : > { %1081 = vrcp.f32 %v596_v29  ;;  %v862_v29 = vld [vmem:[%s340_s30 + $0x8] sm:$0xff] }
 0x367   : > { %v1078_v31 = vpop.eup %1077 }
 0x368   : > { %v599_v30 = vpop.xlane.xlu1 %598  ;;  %v620_v33 = vmul.f32 %v1078_v31, %v1193_v47  ;;  %v368_v46 = vpop.permute.xlu0 %367 }
 0x369   : > { %1083 = vrcp.f32 %v599_v30  ;;  %v428_v48 = vadd.f32 %v1180_v12, %v368_v46 }
 0x36b   : > { %v1080_v32 = vpop.eup %1079  ;;  %v628_v50 = vpack.c.bf16 %v428_v48, %v1178_v10 }
 0x36c   : > { %v621_v34 = vmul.f32 %v1080_v32, %v1197_v51  ;;  %v807_v30 = vpop.permute.xlu0 %806 }
 0x36e   : > { %v630_v35 = vpack.c.bf16 %v621_v34, %v620_v33  ;;  %v863_v33 = vld [vmem:[%s340_s30 + $0x10] sm:$0xff] }
 0x36f   : > { %v1082_v37 = vpop.eup %1081 }
 0x370   : > { %v644_v36 = vsel %vm539_vm3, %v630_v35, 0  ;;  %v622_v40 = vmul.f32 %v1082_v37, %v1201_v54  ;;  %v637_v54 = vrot.slane %v628_v50, 2  ;;  %v864_v37 = vld [vmem:[%s340_s30 + $0x18] sm:$0xff] }
 0x371   : > { %1021 = vmatpush3.bf16.xpose.msra.mxu0 %v644_v36 }
 0x372   : > { %1022 = vmatprep.subr.bf16.mxu0 %v1102_v16 }
 0x373   : > { %v1084_v38 = vpop.eup %1083 }
 0x374   : > { %v608_v39 = vpop.xlane.xlu1 %607  ;;  %v623_v41 = vmul.f32 %v1084_v38, %v1205_v59 }
 0x376   : > { %v631_v42 = vpack.c.bf16 %v623_v41, %v622_v40 }
 0x378   : > { %v602_v43 = vpop.xlane.xlu1 %601  ;;  %v647_v44 = vsel %vm539_vm3, %v631_v42, 0 }
 0x379   : > { %1023 = vmatpush3.bf16.xpose.msra.mxu0 %v647_v44  ;;  %1085 = vrcp.f32 %v602_v43 }
 0x37a   : > { %1024 = vmatprep.subr.bf16.mxu0 %v1102_v16 }
 0x37c   : > { %v611_v45 = vpop.xlane.xlu1 %610 }
 0x380   : > { %v605_v47 = vpop.xlane.xlu1 %604 }
 0x381   : > { %1087 = vrcp.f32 %v605_v47 }
 0x382   : > { %1089 = vrcp.f32 %v611_v45 }
 0x383   : > { %1091 = vrcp.f32 %v608_v39  ;;  %v1086_v53 = vpop.eup %1085 }
 0x384   : > { %v373_v49 = vpop.permute.xlu1 %372  ;;  %v624_v58 = vmul.f32 %v1086_v53, %v1216_v9 }
 0x385   : > { %v433_v51 = vadd.f32 %v1176_v8, %v373_v49 }
 0x387   : > { %v629_v52 = vpack.c.bf16 %v433_v51, %v433_v51 }
 0x388   : > { %v802_v24 = vpop.permute.xlu1 %801 }
 0x389   : > { %v638_v55 = vrot.slane %v629_v52, 2 }
 0x38b   : > { %v1088_v56 = vpop.eup %1087  ;;  %v639_v57 = vsel %vm636_vm5, %v637_v54, %v638_v55 }
 0x38c   : > { %v625_v59 = vmul.f32 %v1088_v56, %v1228_v17  ;;  %v1090_v12 = vpop.eup %1089 }
 0x38d   : > { %v1092_v61 = vpop.eup %1091  ;;  %v627_v10 = vmul.f32 %v1090_v12, %v1223_v14  ;;  %v348_v14 = vld [vmem:[%s335_s24 + $0x8] sm:$0xff] }
 0x38e   : > { %v632_v60 = vpack.c.bf16 %v625_v59, %v624_v58  ;;  %v626_v8 = vmul.f32 %v1092_v61, %v1209_v5  ;;  %v794_v20 = vpack.c.bf16 %v350_v15, %v348_v14 }
 0x390   : > { %v650_v62 = vsel %vm539_vm3, %v632_v60, 0  ;;  %v633_v63 = vpack.c.bf16 %v627_v10, %v626_v8 }
 0x391   : > { %1025 = vmatpush3.bf16.xpose.msra.mxu0 %v650_v62 }
 0x392   : > { %1026 = vmatprep.subr.bf16.mxu0 %v1102_v16  ;;  %v653_v0 = vsel %vm539_vm3, %v633_v63, 0 }
 0x399   : > { %1027 = vmatpush3.bf16.xpose.msra.mxu0 %v653_v0 }
 0x3a0   : > { %1029 = vmatmul.mubr.msk.bf16.vlgmr.msra.gmra.mrb[4].mxu0 %vm539_vm3, %v639_v57 }
 0x473   : > { %v689_v4 = vpop.f32.mrb[4].mxu0 }
 0x474   : > { %v1030_v6 = vpop.f32.mrb[5].mxu0 }
 0x475   : > { %v692_v5 = vpop.f32.mrb[6].mxu0 }
 0x476   : > { %v696_v7 = vpack.c.bf16 %v692_v5, %v689_v4  ;;  %v1031_v9 = vpop.f32.mrb[7].mxu0 }
 0x478   : > { %982 = vmatmul.mubr.msk.bf16.vlgmr.msra.gmra.mrb[8].mxu1 %vm539_vm3, %v696_v7 }
 0x479   : > { %850 = vmatprep.mubr.bf16.mxu1 %v1101_v2  ;;  %v793_v2 = vpack.c.bf16 %v349_v22, %v347_v21 }
 0x54b   : > { %v782_v11 = vpop.f32.mrb[8].mxu1 }
 0x54c   : > { %v784_v13 = vpop.f32.mrb[9].mxu1 }
 0x54d   : > { %v786_v16 = vpop.f32.mrb[10].mxu1 }
 0x54e   : > { %v791_v17 = vpack.c.bf16 %v786_v16, %v782_v11  ;;  %v788_v18 = vpop.f32.mrb[11].mxu1 }
 0x54f   : > { %v792_v19 = vpack.c.bf16 %v788_v18, %v784_v13 }
 0x551   : > { %818 = vmatprep.subr.bf16.mxu1 %v792_v19 }
 0x552   : > { %819 = vmatpush1.bf16.msra.mxu1 %v791_v17 }
 0x553   : > { %820 = vmatprep.subr.bf16.mxu1 %v794_v20 }
 0x556   : > { %821 = vmatpush1.bf16.msra.mxu1 %v793_v2 }
 0x559   : > { %984 = vmatmul.mubr.msk.bf16.vlgmr.msra.gmra.mrb[12].mxu1 %vm814_vm6, %v1060_v23 }
 0x62c   : > { %v852_v25 = vpop.f32.mrb[12].mxu1 }
 0x62d   : > { %v853_v27 = vadd.f32 %v852_v25, %v802_v24  ;;  %v854_v28 = vpop.f32.mrb[13].mxu1 }
 0x62e   : > { %v855_v31 = vadd.f32 %v854_v28, %v802_v24  ;;  %v856_v32 = vpop.f32.mrb[14].mxu1 }
 0x62f   : > { %v865_v34 = vadd.f32 %v861_v26, %v853_v27  ;;  %v857_v35 = vadd.f32 %v856_v32, %v807_v30  ;;  %v858_v36 = vpop.f32.mrb[15].mxu1 }
 0x630   : > { %v866_v38 = vadd.f32 %v862_v29, %v855_v31  ;;  %v859_v39 = vadd.f32 %v858_v36, %v807_v30 }
 0x631   : > { %869 = vst [vmem:[%s345_s11] sm:$0xff] %v865_v34  ;;  %v867_v40 = vadd.f32 %v863_v33, %v857_v35 }
 0x632   : > { %870 = vst [vmem:[%s345_s11 + $0x8] sm:$0xff] %v866_v38  ;;  %v868_v41 = vadd.f32 %v864_v37, %v859_v39 }
 0x633   : > { %871 = vst [vmem:[%s345_s11 + $0x10] sm:$0xff] %v867_v40 }
 0x634   : > { %872 = vst [vmem:[%s345_s11 + $0x18] sm:$0xff] %v868_v41 }
 0x635 PF: > { %s18_s27 = sadd.s32 1, %s1099_s27  }
 0x636   : > { %p15_p4 = scmp.ge.s32.totalorder %s18_s27, 4  }
 0x638   :  { %17 = sbr.rel (!%p15_p4) target bundleno = 1 (0x1), region = 88 }

// kernel: safpn_forward.7
= control target key start
LH: loop header
LB: loop body
LE: loop exit
PB: predicated region body
PF: predicated region fallthrough
CT: control target
= control target key end

     0   :  { %s738_s15 = smov 0   ;;  %s740_s16 = smov 0   ;;  %s853_s0 = inlined_call_operand.vmem [shape: f32[2,8,1024], index: 0, kind: input, shape index: {}]   ;;  %s854_s1 = inlined_call_operand.vmem [shape: bf16[16,8], index: 1, kind: input, shape index: {}]   ;;  %s855_s2 = inlined_call_operand.vmem [shape: f32[16,1], index: 2, kind: input, shape index: {}]   ;;  %s856_s3 = inlined_call_operand.vmem [shape: f32[2,16,1024], index: 3, kind: input, shape index: {}]   ;;  %s857_s4 = inlined_call_operand.vmem [shape: f32[2,16,1024], index: 4, kind: output, shape index: {}]  }
   0x1   :  { %s742_s17 = smov 0   ;;  %s744_s18 = smov 0  }
   0x2   :  { %s746_s19 = smov 0   ;;  %s748_s20 = smov 0  }
   0x3   :  { %s750_s21 = smov 0  }
   0x4 LB: > { %s23_s22 = sadd.s32 1, %s702_s19  ;;  %s26_s23 = sadd.s32 1, %s706_s20  ;;  %s710_s21 = sphi %s750_s21, %s14_s21   ;;  %s706_s20 = sphi %s748_s20, %s864_s20   ;;  %s702_s19 = sphi %s746_s19, %s863_s19   ;;  %s698_s18 = sphi %s744_s18, %s862_s18   ;;  %s694_s17 = sphi %s742_s17, %s861_s17   ;;  %s690_s16 = sphi %s740_s16, %s860_s16   ;;  %s686_s15 = sphi %s738_s15, %s859_s15  }
   0x5   : > { %p24_p0 = scmp.ge.s32.totalorder %s23_s22, 2  ;;  %s572_s24 = sadd.s32 4294967295, %s710_s21  }
   0x6   : > { %p112_p1 = scmp.ne.s32.totalorder %s690_s16, %s686_s15  ;;  %p113_p2 = scmp.eq.s32.totalorder %s710_s21, 0 }
   0x7   : > { %s866_s22 = smov (%p24_p0, %s23_s22), 0  ;;  %s868_s23 = smov (!%p24_p0, %s26_s23), %s706_s20 }
   0x8   : > { %p28_p3 = scmp.ge.s32.totalorder %s868_s23, 2  ;;  %p144_p4 = scmp.eq.s32.totalorder %s572_s24, 3 }
   0x9   : > { %s101_s25 = ssub.s32 %s702_s19, %s866_s22  ;;  %p114_p5 = por %p113_p2, %p112_p1 }
   0xa   : > { %s870_s23 = smov (%p28_p3, %s868_s23), 0  ;;  %p786_p6 = por %p144_p4, %p112_p1 }
   0xb   : > { %s100_s27 = ssub.s32 %s706_s20, %s870_s23  ;;  %s105_s29 = sadd.s32 1, %s690_s16 }
   0xc   : > { %s102_s28 = sor.u32 %s101_s25, %s100_s27  ;;  %p575_p8 = scmp.ge.s32.totalorder %s710_s21, 4 }
   0xd   : > { %p103_p7 = scmp.eq.s32.totalorder %s102_s28, 0 }
   0xe   : > { %172 = sbr.rel (%p575_p8) target bundleno = 32 (0x20), region = 24 }
   0xf   : > { %s794_s30 = scalar_select %p103_p7, %s690_s16, %s105_s29  }
  0x15   : > { %188 = sbr.rel (!%p114_p5) target bundleno = 32 (0x20), region = 32  ;;  %s190_s5 = sand.u32 (%p114_p5), 1, %s690_s16  }
  0x16   : > { %s577_s6 = sshll.u32 (%p114_p5), %s702_s19, 2  ;;  %s576_s7 = sshll.u32 (%p114_p5), %s190_s5, 6 }
  0x17   : > { %s578_s8 = sshll.u32 (%p114_p5), %s706_s20, 4  ;;  %s192_s14 = scalar_lea.vmem (%p114_p5), [#allocation2], %s576_s7 }
  0x18   : > { %s195_s9 = sadd.s32 (%p114_p5), %s578_s8, %s577_s6 }
  0x19   : > { %s579_s10 = sshll.u32 (%p114_p5), %s195_s9, 3 }
  0x1a   : > { %s197_s13 = scalar_lea.vmem (%p114_p5), %s856_s3, %s579_s10 }
  0x1b   : > { %v210_v0 = vld [vmem:[%s197_s13] sm:$0xff] (%p114_p5)  ;;  %v212_v1 = vld [vmem:[%s197_s13 + $0x8] sm:$0xff] (%p114_p5)  ;;  %v214_v2 = vld [vmem:[%s197_s13 + $0x10] sm:$0xff] (%p114_p5) }
  0x1c   : > { %211 = vst [vmem:[%s192_s14] sm:$0xff] %v210_v0  ;;  %213 = vst [vmem:[%s192_s14 + $0x8] sm:$0xff] %v212_v1  ;;  %v216_v3 = vld [vmem:[%s197_s13 + $0x18] sm:$0xff]  ;;  %v218_v4 = vld [vmem:[%s197_s13 + $0x40] sm:$0xff] }
  0x1d   : > { %215 = vst [vmem:[%s192_s14 + $0x10] sm:$0xff] %v214_v2  ;;  %v220_v5 = vld [vmem:[%s197_s13 + $0x48] sm:$0xff]  ;;  %217 = vst [vmem:[%s192_s14 + $0x18] sm:$0xff] %v216_v3  ;;  %v222_v6 = vld [vmem:[%s197_s13 + $0x50] sm:$0xff] }
  0x1e   : > { %219 = vst [vmem:[%s192_s14 + $0x20] sm:$0xff] %v218_v4  ;;  %221 = vst [vmem:[%s192_s14 + $0x28] sm:$0xff] %v220_v5  ;;  %v224_v7 = vld [vmem:[%s197_s13 + $0x58] sm:$0xff] }
  0x1f   : > { %223 = vst [vmem:[%s192_s14 + $0x30] sm:$0xff] %v222_v6  ;;  %225 = vst [vmem:[%s192_s14 + $0x38] sm:$0xff] %v224_v7 }
  0x20 PF: > { %p580_p9 = scmp.ge.s32.totalorder %s710_s21, 1  ;;  %p230_p10 = scmp.lt.s32.totalorder %s710_s21, 5 }
  0x22   : > { %p231_p11 = pnand %p580_p9, %p230_p10 }
  0x23   : > { %s806_s24 = sshll.u32 (!%p231_p11), %s694_s17, 2  ;;  %p271_p12 = scmp.lt.s32.totalorder (!%p231_p11), %s698_s18, 1  ;;  %v712_v8 = vmov (!%p231_p11), 0   ;;  %v293_v9 = vld [vmem:[%s855_s2] sm:$0xff] (!%p231_p11)  ;;  %v294_v10 = vld [vmem:[%s855_s2 + $0x8] sm:$0xff] (!%p231_p11)  ;;  %vm314_vm0 = vcmask (!%p231_p11), 1043456  }
  0x24   : > { %234 = sbr.rel (%p231_p11) target bundleno = 285 (0x11d), region = 55  ;;  %p273_p13 = scmp.lt.s32.totalorder (!%p231_p11), %s806_s24, 7  ;;  %359 = vmatprep.mubr.bf16.mxu0 (!%p231_p11), %v712_v8  ;;  %402 = vmatprep.mubr.bf16.mxu1 (!%p231_p11), %v712_v8  ;;  %v655_v20 = vld [vmem:[%s854_s1] sm:$0xff] (!%p231_p11)   ;;  %vm310_vm1 = vcmask (!%p231_p11), 64512  }
  0x25   : > { %654 = vset.pattern.permute.xlu0 (!%p231_p11), %v712_v8  ;;  %s237_s14 = sand.u32 (!%p231_p11), 1, %s686_s15  }
  0x26   : > { %297 = vperm.xlu0 (!%p231_p11), %654, %v293_v9   ;;  %s581_s25 = sshll.u32 (!%p231_p11), %s237_s14, 6 }
  0x27   : > { %s239_s27 = scalar_lea.vmem (!%p231_p11), [#allocation2], %s581_s25  ;;  %s269_s15 = scalar_lea.vmem (!%p231_p11), [#allocation3], %s581_s25 }
  0x28   : > { %v413_v25 = vld [vmem:[%s239_s27] sm:$0xff] (!%p231_p11)  ;;  %v415_v28 = vld [vmem:[%s239_s27 + $0x10] sm:$0xff] (!%p231_p11)  ;;  %v414_v30 = vld [vmem:[%s239_s27 + $0x8] sm:$0xff] (!%p231_p11) }
  0x29   : > { %v416_v34 = vld [vmem:[%s239_s27 + $0x18] sm:$0xff] (!%p231_p11)  ;;  %v417_v36 = vld [vmem:[%s239_s27 + $0x20] sm:$0xff] (!%p231_p11)  ;;  %v419_v41 = vld [vmem:[%s239_s27 + $0x30] sm:$0xff] (!%p231_p11) }
  0x2a   : > { %302 = vperm.xlu0 (!%p231_p11), %654, %v294_v10   ;;  %v418_v43 = vld [vmem:[%s239_s27 + $0x28] sm:$0xff] (!%p231_p11)  ;;  %v420_v49 = vld [vmem:[%s239_s27 + $0x38] sm:$0xff] (!%p231_p11) }
  0x2b   : > { %s272_s28 = scalar_select %p271_p12, %s698_s18, 1 }
  0x2c   : > { %s274_s29 = scalar_select %p273_p13, %s806_s24, 7 }
  0x2d   : > { %s584_s5 = sshll.u32 %s272_s28, 3  ;;  %s593_s28 = sshll.u32 (%p786_p6), %s698_s18, 4 }
  0x2e   : > { %s276_s17 = sadd.s32 %s584_s5, %s274_s29  ;;  %s446_s29 = sadd.s32 (%p786_p6), %s593_s28, %s806_s24 }
  0x2f   : > { %s585_s8 = sshll.u32 %s276_s17, 3  ;;  %s594_s5 = sshll.u32 (%p786_p6), %s446_s29, 3 }
  0x30   : > { %s278_s11 = scalar_lea.vmem %s853_s0, %s585_s8  ;;  %s448_s17 = scalar_lea.vmem (%p786_p6), %s857_s4, %s594_s5 }
  0x31   : > { %v286_v11 = vld [vmem:[%s278_s11 + $0x8] sm:$0xff]  ;;  %v288_v12 = vld [vmem:[%s278_s11 + $0x18] sm:$0xff]  ;;  %v285_v13 = vld [vmem:[%s278_s11] sm:$0xff] }
  0x32   : > { %v290_v14 = vpack.c.bf16 %v286_v11, %v286_v11  ;;  %v292_v15 = vpack.c.bf16 %v288_v12, %v288_v12  ;;  %v289_v16 = vpack.c.bf16 %v285_v13, %v285_v13  ;;  %v287_v17 = vld [vmem:[%s278_s11 + $0x10] sm:$0xff] }
  0x33   : > { %v291_v18 = vpack.c.bf16 %v287_v17, %v287_v17 }
  0x34   : > { %587 = vmatprep.subr.msk.bf16.mxu0 %vm314_vm0, %v290_v14  ;;  %589 = vmatprep.subr.msk.bf16.mxu1 %vm314_vm0, %v292_v15  ;;  %v316_v19 = vsel %vm314_vm0, %v289_v16, 0 }
  0x35   : > { %328 = vmatpush1.bf16.msra.mxu0 %v316_v19  ;;  %v322_v21 = vsel %vm314_vm0, %v291_v18, 0 }
  0x36   : > { %371 = vmatpush1.bf16.msra.mxu1 %v322_v21 }
  0x38   : > { %588 = vmatmul.mubr.msk.bf16.vlgmr.msra.gmra.mrb[0].mxu0 %vm310_vm1, %v655_v20 }
  0x39   : > { %590 = vmatmul.mubr.msk.bf16.vlgmr.msra.gmra.mrb[0].mxu1 %vm310_vm1, %v655_v20 }
  0xa5   : > { %v298_v22 = vpop.permute.xlu0 %297 }
  0xa9   : > { %v303_v23 = vpop.permute.xlu0 %302 }
 0x10b   : > { %v361_v24 = vpop.f32.mrb[0].mxu0 }
 0x10c   : > { %v362_v26 = vadd.f32 %v361_v24, %v298_v22  ;;  %v404_v27 = vpop.f32.mrb[0].mxu1  ;;  %v363_v29 = vpop.f32.mrb[1].mxu0 }
 0x10d   : > { %v405_v31 = vadd.f32 %v404_v27, %v298_v22  ;;  %v364_v32 = vadd.f32 %v363_v29, %v298_v22  ;;  %v406_v33 = vpop.f32.mrb[1].mxu1  ;;  %v365_v35 = vpop.f32.mrb[2].mxu0 }
 0x10e   : > { %v421_v37 = vadd.f32 %v413_v25, %v362_v26  ;;  %v407_v38 = vadd.f32 %v406_v33, %v298_v22  ;;  %v366_v39 = vadd.f32 %v365_v35, %v303_v23  ;;  %v408_v40 = vpop.f32.mrb[2].mxu1  ;;  %v367_v42 = vpop.f32.mrb[3].mxu0  ;;  %443 = sbr.rel (!%p786_p6) target bundleno = 285 (0x11d), region = 63 }
 0x10f   : > { %v423_v44 = vadd.f32 %v415_v28, %v405_v31  ;;  %v422_v45 = vadd.f32 %v414_v30, %v364_v32  ;;  %v409_v46 = vadd.f32 %v408_v40, %v303_v23  ;;  %v368_v47 = vadd.f32 %v367_v42, %v303_v23  ;;  %v410_v48 = vpop.f32.mrb[3].mxu1 }
 0x110   : > { %429 = vst [vmem:[%s269_s15] sm:$0xff] %v421_v37  ;;  %v424_v50 = vadd.f32 %v416_v34, %v407_v38  ;;  %v425_v51 = vadd.f32 %v417_v36, %v366_v39  ;;  %v411_v52 = vadd.f32 %v410_v48, %v303_v23 }
 0x111   : > { %431 = vst [vmem:[%s269_s15 + $0x10] sm:$0xff] %v423_v44  ;;  %430 = vst [vmem:[%s269_s15 + $0x8] sm:$0xff] %v422_v45  ;;  %v427_v53 = vadd.f32 %v419_v41, %v409_v46  ;;  %v426_v54 = vadd.f32 %v418_v43, %v368_v47 }
 0x112   : > { %432 = vst [vmem:[%s269_s15 + $0x18] sm:$0xff] %v424_v50  ;;  %433 = vst [vmem:[%s269_s15 + $0x20] sm:$0xff] %v425_v51  ;;  %v428_v55 = vadd.f32 %v420_v49, %v411_v52 }
 0x113   : > { %435 = vst [vmem:[%s269_s15 + $0x30] sm:$0xff] %v427_v53  ;;  %434 = vst [vmem:[%s269_s15 + $0x28] sm:$0xff] %v426_v54 }
 0x114   : > { %436 = vst [vmem:[%s269_s15 + $0x38] sm:$0xff] %v428_v55 }
 0x117   : > { %v461_v56 = vld [vmem:[%s269_s15] sm:$0xff] }
 0x118   : > { %v463_v57 = vld [vmem:[%s269_s15 + $0x8] sm:$0xff]  ;;  %v465_v58 = vld [vmem:[%s269_s15 + $0x10] sm:$0xff]  ;;  %462 = vst [vmem:[%s448_s17] sm:$0xff] %v461_v56 }
 0x119   : > { %v467_v59 = vld [vmem:[%s269_s15 + $0x18] sm:$0xff]  ;;  %v469_v60 = vld [vmem:[%s269_s15 + $0x20] sm:$0xff]  ;;  %464 = vst [vmem:[%s448_s17 + $0x8] sm:$0xff] %v463_v57  ;;  %466 = vst [vmem:[%s448_s17 + $0x10] sm:$0xff] %v465_v58 }
 0x11a   : > { %v471_v61 = vld [vmem:[%s269_s15 + $0x28] sm:$0xff]  ;;  %v473_v62 = vld [vmem:[%s269_s15 + $0x30] sm:$0xff]  ;;  %468 = vst [vmem:[%s448_s17 + $0x18] sm:$0xff] %v467_v59  ;;  %470 = vst [vmem:[%s448_s17 + $0x40] sm:$0xff] %v469_v60 }
 0x11b   : > { %v475_v63 = vld [vmem:[%s269_s15 + $0x38] sm:$0xff]  ;;  %472 = vst [vmem:[%s448_s17 + $0x48] sm:$0xff] %v471_v61  ;;  %474 = vst [vmem:[%s448_s17 + $0x50] sm:$0xff] %v473_v62 }
 0x11c   : > { %476 = vst [vmem:[%s448_s17 + $0x58] sm:$0xff] %v475_v63 }
 0x11d PF: > { %s14_s21 = sadd.s32 1, %s710_s21   ;;  %s859_s15 = smov %s690_s16 }
 0x11e   : > { %p11_p0 = scmp.ge.s32.totalorder %s14_s21, 6   ;;  %s860_s16 = smov %s794_s30 }
 0x11f   : > { %s861_s17 = smov %s702_s19  ;;  %s862_s18 = smov %s706_s20 }
 0x120   : > { %s863_s19 = smov %s866_s22  ;;  %s864_s20 = smov %s870_s23 }
 0x121   :  { %13 = sbr.rel (!%p11_p0) target bundleno = 4 (0x4), region = 120 }

</bundles_post_ra>
